<compile_context>
chip_gen: v6e
topology: v6e:2x2x1
jax: 0.10.0
libtpu: 0.0.40
codegen_flags: <defaults>
</compile_context>

<pallas_src>
import functools
import math

import jax
import jax.numpy as jnp
from jax import lax
from jax.experimental import pallas as pl
from jax.experimental.pallas import tpu as pltpu

_INV_SQRT2 = 1.0 / math.sqrt(2.0)
_SQRT_2_OVER_PI = math.sqrt(2.0 / math.pi)
_LN_EPS = 1e-6

_TM_CANDIDATES = (1024, 512, 256, 128, 64, 32, 16, 8)
_TH_CANDIDATES = (2048, 1024, 512, 256, 128)


def _round_up(a, b):
    return ((a + b - 1) // b) * b


def _vmem_cap_bytes():
    """Physical VMEM per TensorCore (generation-aware); conservative fallback."""
    try:
        cap = int(getattr(pltpu.get_tpu_info(), "vmem_capacity_bytes", 0) or 0)
        if cap > 0:
            return cap
    except Exception:
        pass
    return 64 << 20  # v7x-sized fallback (safe lower bound for v5e/v6e too)


def _supports_pipeline_mode():
    if not hasattr(pl, "Buffered"):
        return False
    try:
        pl.BlockSpec((8, 128), lambda i: (0, 0), pipeline_mode=pl.Buffered(1))
        return True
    except Exception:
        return False


_PIPELINE_MODE_OK = _supports_pipeline_mode()


def _invariant_spec(shape, index_map):
    """Grid-invariant operand: single-buffered when the JAX version supports it."""
    if _PIPELINE_MODE_OK:
        try:
            return pl.BlockSpec(shape, index_map, pipeline_mode=pl.Buffered(1))
        except Exception:
            pass
    return pl.BlockSpec(shape, index_map)


def _gelu(h, approximate):
    if approximate:
        # tanh approximation -> EUP slot (frees the VALU on v6e/v7x)
        return 0.5 * h * (1.0 + jnp.tanh(_SQRT_2_OVER_PI * (h + 0.044715 * h * h * h)))
    # exact erf-based GELU (torch nn.GELU() default)
    return 0.5 * h * (1.0 + lax.erf(h * _INV_SQRT2))


def _residual_layernorm(x_f32, y_f32, b2, gamma, beta, e_true):
    """residual + fc2 bias + LayerNorm over the (possibly zero-padded) last dim."""
    r = x_f32 + y_f32 + b2                       # padded E columns are exactly 0
    e_pad = r.shape[-1]
    inv_e = 1.0 / float(e_true)
    mean = jnp.sum(r, axis=-1, keepdims=True) * inv_e
    cen = r - mean
    if e_pad != e_true:
        col = lax.broadcasted_iota(jnp.int32, r.shape, r.ndim - 1)
        cen = jnp.where(col < e_true, cen, 0.0)  # mask pad cols out of the variance
    var = jnp.sum(cen * cen, axis=-1, keepdims=True) * inv_e
    return cen * lax.rsqrt(var + _LN_EPS) * gamma + beta


def _mlp_kernel_resident(x_ref, w1_ref, b1_ref, w2_ref, b2_ref, g_ref, beta_ref,
                         o_ref, *, compute_dtype, e_true, gelu_approx, precision):
    """Whole hidden dim in one step: weights stay VMEM-resident across token tiles."""
    x = x_ref[...]
    h = jnp.dot(x.astype(compute_dtype), w1_ref[...],
                preferred_element_type=jnp.float32, precision=precision)
    h = _gelu(h + b1_ref[...], gelu_approx)
    y = jnp.dot(h.astype(compute_dtype), w2_ref[...],
                preferred_element_type=jnp.float32, precision=precision)
    out = _residual_layernorm(x.astype(jnp.float32), y, b2_ref[...],
                              g_ref[...], beta_ref[...], e_true)
    o_ref[...] = out.astype(o_ref.dtype)


def _mlp_kernel_chunked(x_ref, w1_ref, b1_ref, w2_ref, b2_ref, g_ref, beta_ref,
                        o_ref, acc_ref, *, compute_dtype, e_true, gelu_approx,
                        precision):
    """Hidden dim streamed in lane-dense chunks; fc2 partials accumulate in f32."""
    k = pl.program_id(1)

    @pl.when(k == 0)
    def _init():
        acc_ref[...] = jnp.zeros_like(acc_ref)

    x = x_ref[...]
    h = jnp.dot(x.astype(compute_dtype), w1_ref[...],
                preferred_element_type=jnp.float32, precision=precision)
    h = _gelu(h + b1_ref[...], gelu_approx)
    acc_ref[...] += jnp.dot(h.astype(compute_dtype), w2_ref[...],
                            preferred_element_type=jnp.float32, precision=precision)

    @pl.when(k == pl.num_programs(1) - 1)
    def _finalize():
        out = _residual_layernorm(x_ref[...].astype(jnp.float32), acc_ref[...],
                                  b2_ref[...], g_ref[...], beta_ref[...], e_true)
        o_ref[...] = out.astype(o_ref.dtype)


def prepare_params(w1, b1, w2, b2, gamma, beta, *, compute_dtype=jnp.bfloat16,
                   hidden_chunk=None):
    """One-time weight cast/pad + hidden-dim tiling decision.

    Hoisted out of the forward so repeated calls don't re-stream the weights
    through XLA. `hidden_chunk` forces the chunked path (testing / huge E)."""
    E, H = int(w1.shape[0]), int(w1.shape[1])
    f32 = jnp.float32
    E_pad = _round_up(E, 128)          # lane-dense output / LayerNorm columns
    H128 = _round_up(H, 128)
    wb = jnp.dtype(compute_dtype).itemsize
    budget = _vmem_cap_bytes() * 8 // 10
    weight_buf = 1 if _PIPELINE_MODE_OK else 2

    def act_floor(hdim, with_acc):
        tm0 = 128
        bts = tm0 * (4 * E_pad * 4 + 2 * hdim * 4)   # in/out tiles (x2 buf) + fc1 interm.
        if with_acc:
            bts += tm0 * E_pad * 4
        return bts

    if hidden_chunk is not None:
        th = min(_round_up(int(hidden_chunk), 128), H128)
    else:
        resident_bytes = weight_buf * (2 * E_pad * H128 * wb + H128 * 4) + 3 * E_pad * 4
        if resident_bytes + act_floor(H128, False) <= budget:
            th = H128                  # weights stay VMEM-resident
        else:
            fitting = [c for c in _TH_CANDIDATES
                       if c < H128 and (2 * (2 * E_pad * c * wb + c * 4) + 3 * E_pad * 4
                                        + act_floor(c, True)) <= budget]
            divs = [c for c in fitting if H128 % c == 0]
            th = divs[0] if divs else (fitting[0] if fitting else 128)

    H_pad = _round_up(H128, th)
    resident = th >= H_pad

    w1p = jnp.pad(w1.astype(f32), ((0, E_pad - E), (0, H_pad - H)))
    b1p = jnp.pad(b1.astype(f32).reshape(1, H), ((0, 0), (0, H_pad - H)))
    w2p = jnp.pad(w2.astype(f32), ((0, H_pad - H), (0, E_pad - E)))
    b2p = jnp.pad(b2.astype(f32).reshape(1, E), ((0, 0), (0, E_pad - E)))
    gp = jnp.pad(gamma.astype(f32).reshape(1, E), ((0, 0), (0, E_pad - E)))
    bp = jnp.pad(beta.astype(f32).reshape(1, E), ((0, 0), (0, E_pad - E)))

    return dict(
        w1=w1p.astype(compute_dtype), b1=b1p,
        w2=w2p.astype(compute_dtype), b2=b2p, gamma=gp, beta=bp,
        E=E, E_pad=E_pad, H=H, H_pad=H_pad, th=int(th),
        compute_dtype=jnp.dtype(compute_dtype), resident=bool(resident),
    )


def mlp_forward_prepared(x, params, *, tm=None, gelu_approximate=None):
    """x: [..., E] -> [..., E] (same dtype as x)."""
    E = params["E"]
    E_pad = params["E_pad"]
    H_pad = params["H_pad"]
    th = params["th"]
    cdt = params["compute_dtype"]
    resident = params["resident"]
    assert x.shape[-1] == E, "last dim must equal embedding_dim"
    orig_shape = x.shape
    N = int(math.prod(orig_shape[:-1]))
    x2 = x.reshape(N, E)

    if gelu_approximate is None:
        gelu_approximate = jnp.dtype(cdt) != jnp.dtype(jnp.float32)
    precision = (lax.Precision.HIGHEST
                 if jnp.dtype(cdt) == jnp.dtype(jnp.float32) else None)

    xb = x2.dtype.itemsize
    wb = jnp.dtype(cdt).itemsize
    gran = 16 if jnp.dtype(x2.dtype) == jnp.dtype(jnp.bfloat16) else 8
    cap = _vmem_cap_bytes()
    budget = cap * 8 // 10

    weight_buf = 1 if (_PIPELINE_MODE_OK and resident) else 2
    if resident:
        hdim = H_pad
        weight_bytes = weight_buf * (2 * E_pad * H_pad * wb + H_pad * 4)
        acc_bytes = 0
    else:
        hdim = th
        weight_bytes = 2 * (2 * E_pad * th * wb + th * 4)
        acc_bytes = E_pad * 4
    weight_bytes += 2 * 3 * E_pad * 4               # b2 / gamma / beta

    def vmem_use(tm_):
        return (weight_bytes
                + 2 * tm_ * E_pad * xb              # x tiles (double-buffered)
                + 2 * tm_ * E_pad * xb              # out tiles
                + tm_ * acc_bytes                   # f32 accumulator scratch
                + 2 * tm_ * hdim * 4)               # fc1/GELU f32 intermediate headroom

    N8 = _round_up(N, gran)
    # keep >= 2 token tiles whenever possible so v7x's second TensorCore has work
    tm_cap = _round_up((N8 + 1) // 2, gran) if N8 >= 2 * gran else N8
    if tm is None:
        tm_eff = gran
        for cand in _TM_CANDIDATES:
            if cand <= tm_cap and vmem_use(cand) <= budget:
                tm_eff = cand
                break
    else:
        tm_eff = max(gran, min(_round_up(int(tm), gran), N8))
    N_pad = _round_up(N, tm_eff)

    pad_r, pad_c = N_pad - N, E_pad - E
    if pad_r or pad_c:
        x2 = jnp.pad(x2, ((0, pad_r), (0, pad_c)))

    common = dict(compute_dtype=cdt, e_true=E,
                  gelu_approx=bool(gelu_approximate), precision=precision)

    if resident:
        grid = (N_pad // tm_eff,)
        kernel = functools.partial(_mlp_kernel_resident, **common)
        in_specs = [
            pl.BlockSpec((tm_eff, E_pad), lambda i: (i, 0)),      # x tile
            _invariant_spec((E_pad, H_pad), lambda i: (0, 0)),    # W1 (resident)
            _invariant_spec((1, H_pad), lambda i: (0, 0)),        # b1
            _invariant_spec((H_pad, E_pad), lambda i: (0, 0)),    # W2 (resident)
            _invariant_spec((1, E_pad), lambda i: (0, 0)),        # b2
            _invariant_spec((1, E_pad), lambda i: (0, 0)),        # gamma
            _invariant_spec((1, E_pad), lambda i: (0, 0)),        # beta
        ]
        out_spec = pl.BlockSpec((tm_eff, E_pad), lambda i: (i, 0))
        scratch = []
        dims = ("parallel",)
    else:
        grid = (N_pad // tm_eff, H_pad // th)
        kernel = functools.partial(_mlp_kernel_chunked, **common)
        in_specs = [
            pl.BlockSpec((tm_eff, E_pad), lambda i, k: (i, 0)),   # x tile
            pl.BlockSpec((E_pad, th), lambda i, k: (0, k)),       # W1 slice
            pl.BlockSpec((1, th), lambda i, k: (0, k)),           # b1 slice
            pl.BlockSpec((th, E_pad), lambda i, k: (k, 0)),       # W2 slice
            _invariant_spec((1, E_pad), lambda i, k: (0, 0)),     # b2
            _invariant_spec((1, E_pad), lambda i, k: (0, 0)),     # gamma
            _invariant_spec((1, E_pad), lambda i, k: (0, 0)),     # beta
        ]
        out_spec = pl.BlockSpec((tm_eff, E_pad), lambda i, k: (i, 0))
        scratch = [pltpu.VMEM((tm_eff, E_pad), jnp.float32)]
        dims = ("parallel", "arbitrary")

    need = vmem_use(tm_eff)
    vmem_limit = int(min(max(need * 5 // 4 + (2 << 20), 32 << 20), cap * 9 // 10))

    cost = pl.CostEstimate(
        flops=4 * N_pad * E_pad * H_pad,
        transcendentals=N_pad * H_pad,
        bytes_accessed=(2 * N_pad * E_pad * xb
                        + 2 * E_pad * H_pad * wb + H_pad * 4 + 3 * E_pad * 4),
    )

    out2 = pl.pallas_call(
        kernel,
        out_shape=jax.ShapeDtypeStruct((N_pad, E_pad), x.dtype),
        grid_spec=pltpu.PrefetchScalarGridSpec(
            num_scalar_prefetch=0,
            grid=grid,
            in_specs=in_specs,
            out_specs=out_spec,
            scratch_shapes=scratch,
        ),
        compiler_params=pltpu.CompilerParams(
            dimension_semantics=dims,
            vmem_limit_bytes=vmem_limit,
        ),
        cost_estimate=cost,
    )(x2, params["w1"], params["b1"], params["w2"], params["b2"],
      params["gamma"], params["beta"])

    return out2[:N, :E].reshape(orig_shape)


def mlp_forward(x, w1, b1, w2, b2, gamma, beta, *, compute_dtype=jnp.bfloat16,
                hidden_chunk=None, tm=None, gelu_approximate=None):
    """Convenience wrapper: prepares params then runs the kernel (one-shot use)."""
    params = prepare_params(w1, b1, w2, b2, gamma, beta,
                            compute_dtype=compute_dtype, hidden_chunk=hidden_chunk)
    return mlp_forward_prepared(x, params, tm=tm, gelu_approximate=gelu_approximate)


def init_params(key, embedding_dim):
    """Deterministic parameter init mirroring nn.Linear / nn.LayerNorm shapes."""
    E = embedding_dim
    H = 4 * E
    k1, k2, k3, k4 = jax.random.split(key, 4)
    bound1 = 1.0 / math.sqrt(E)
    bound2 = 1.0 / math.sqrt(H)
    w1 = jax.random.uniform(k1, (E, H), jnp.float32, -bound1, bound1)
    b1 = jax.random.uniform(k2, (H,), jnp.float32, -bound1, bound1)
    w2 = jax.random.uniform(k3, (H, E), jnp.float32, -bound2, bound2)
    b2 = jax.random.uniform(k4, (E,), jnp.float32, -bound2, bound2)
    gamma = jnp.ones((E,), jnp.float32)   # LayerNorm weight
    beta = jnp.zeros((E,), jnp.float32)   # LayerNorm bias
    return w1, b1, w2, b2, gamma, beta


def mlp_reference(x, w1, b1, w2, b2, gamma, beta, compute_dtype=jnp.float32,
                  gelu_approximate=False):
    """Pure-JAX reference with the same matmul input quantization / GELU flavor."""
    f32 = jnp.float32
    prec = (lax.Precision.HIGHEST
            if jnp.dtype(compute_dtype) == jnp.dtype(jnp.float32) else None)
    h = jnp.einsum("...e,eh->...h", x.astype(compute_dtype), w1.astype(compute_dtype),
                   preferred_element_type=f32, precision=prec) + b1.astype(f32)
    h = _gelu(h, gelu_approximate)
    y = jnp.einsum("...h,he->...e", h.astype(compute_dtype), w2.astype(compute_dtype),
                   preferred_element_type=f32, precision=prec) + b2.astype(f32)
    r = x.astype(f32) + y
    mean = jnp.mean(r, axis=-1, keepdims=True)
    var = jnp.mean((r - mean) ** 2, axis=-1, keepdims=True)
    return (r - mean) * lax.rsqrt(var + _LN_EPS) * gamma + beta


# TODO(synk): the original module also stashes intermediates in Python globals
# (y_before_mlp / y_after_mlp_res / y_after_mlp_LN); only the returned LN output
# is produced here.

if __name__ == "__main__":
    key = jax.random.PRNGKey(0)
    kp, kx, kp2, kx2 = jax.random.split(key, 4)

    # Case 1: RoBERTa-style block at tiny E=32 (E padded to 128 for lane-dense
    # stores, LayerNorm masked to true E), f32 weights + exact erf GELU,
    # resident-weight path, prepared params reused.
    B, S, E = 2, 8, 32
    w1, b1, w2, b2, gamma, beta = init_params(kp, E)
    x = jax.random.normal(kx, (B, S, E), jnp.float32)
    prep = prepare_params(w1, b1, w2, b2, gamma, beta, compute_dtype=jnp.float32)
    out = jax.block_until_ready(mlp_forward_prepared(x, prep))
    ref = mlp_reference(x, w1, b1, w2, b2, gamma, beta,
                        compute_dtype=jnp.float32, gelu_approximate=False)
    assert out.shape == (B, S, E)
    assert jnp.allclose(out, ref, atol=1e-4, rtol=1e-4), "f32 resident path mismatch"

    # Case 2: default bf16 MXU path (tanh/EUP GELU, f32 accumulation / epilogue).
    out_bf = jax.block_until_ready(mlp_forward(x, w1, b1, w2, b2, gamma, beta))
    ref_bf = mlp_reference(x, w1, b1, w2, b2, gamma, beta,
                           compute_dtype=jnp.bfloat16, gelu_approximate=True)
    assert jnp.allclose(out_bf, ref_bf, atol=5e-3, rtol=5e-3), "bf16 path mismatch"

    # Case 3: hidden-dim chunked path (H=512 streamed in 128-wide slices, 4
    # reduction steps) with a token count not divisible by the tile.
    B2, S2, E2 = 2, 7, 128
    p2 = init_params(kp2, E2)
    x2 = jax.random.normal(kx2, (B2, S2, E2), jnp.float32)
    prep2 = prepare_params(*p2, compute_dtype=jnp.float32, hidden_chunk=128)
    out2 = jax.block_until_ready(mlp_forward_prepared(x2, prep2))
    ref2 = mlp_reference(x2, *p2, compute_dtype=jnp.float32, gelu_approximate=False)
    assert out2.shape == (B2, S2, E2)
    assert jnp.allclose(out2, ref2, atol=2e-3, rtol=2e-3), "chunked path mismatch"

    print("KERNEL_OK")
</pallas_src>

<mosaic_0001>
module attributes {stable_mosaic.version = 11 : i64} {
  func.func @_mlp_kernel_resident(%arg0: i32, %arg1: memref<8x128xf32, #tpu.memory_space<vmem>>, %arg2: memref<128x128xf32, #tpu.memory_space<vmem>>, %arg3: memref<1x128xf32, #tpu.memory_space<vmem>>, %arg4: memref<128x128xf32, #tpu.memory_space<vmem>>, %arg5: memref<1x128xf32, #tpu.memory_space<vmem>>, %arg6: memref<1x128xf32, #tpu.memory_space<vmem>>, %arg7: memref<1x128xf32, #tpu.memory_space<vmem>>, %arg8: memref<8x128xf32, #tpu.memory_space<vmem>>) attributes {dimension_semantics = [#tpu.dimension_semantics<parallel>], iteration_bounds = array<i64: 2>, scalar_prefetch = 0 : i64, scratch_operands = 0 : i64, tpu.core_type = #tpu.core_type<tc>, window_params = [{transform_indices = @transform_0, window_bounds = array<i64: 8, 128>}, {pipeline_mode = #tpu.pipeline_mode<synchronous>, transform_indices = @transform_1, window_bounds = array<i64: 128, 128>}, {pipeline_mode = #tpu.pipeline_mode<synchronous>, transform_indices = @transform_2, window_bounds = array<i64: 1, 128>}, {pipeline_mode = #tpu.pipeline_mode<synchronous>, transform_indices = @transform_3, window_bounds = array<i64: 128, 128>}, {pipeline_mode = #tpu.pipeline_mode<synchronous>, transform_indices = @transform_4, window_bounds = array<i64: 1, 128>}, {pipeline_mode = #tpu.pipeline_mode<synchronous>, transform_indices = @transform_5, window_bounds = array<i64: 1, 128>}, {pipeline_mode = #tpu.pipeline_mode<synchronous>, transform_indices = @transform_6, window_bounds = array<i64: 1, 128>}, {transform_indices = @transform_7, window_bounds = array<i64: 8, 128>}]} {
    %c0 = arith.constant 0 : index
    %c0_0 = arith.constant 0 : index
    %0 = vector.load %arg1[%c0, %c0_0] : memref<8x128xf32, #tpu.memory_space<vmem>>, vector<8x128xf32>
    %c0_1 = arith.constant 0 : index
    %c0_2 = arith.constant 0 : index
    %1 = vector.load %arg2[%c0_1, %c0_2] : memref<128x128xf32, #tpu.memory_space<vmem>>, vector<128x128xf32>
    %cst = arith.constant dense<0.000000e+00> : vector<8x128xf32>
    %2 = tpu.matmul %0, %1, %cst {dimension_numbers = #tpu.dot_dimension_numbers<[1], [0], [0], [1], [0, 0, 1, 1], [], []>, precision = #tpu.contract_precision<fp32>} : vector<8x128xf32>, vector<128x128xf32>, vector<8x128xf32> -> vector<8x128xf32>
    %c0_3 = arith.constant 0 : index
    %c0_4 = arith.constant 0 : index
    %3 = vector.load %arg3[%c0_3, %c0_4] : memref<1x128xf32, #tpu.memory_space<vmem>>, vector<1x128xf32>
    %4 = vector.broadcast %3 : vector<1x128xf32> to vector<8x128xf32>
    %5 = arith.addf %2, %4 : vector<8x128xf32>
    %cst_5 = arith.constant 5.000000e-01 : f32
    %6 = vector.broadcast %cst_5 : f32 to vector<8x128xf32>
    %7 = arith.mulf %6, %5 : vector<8x128xf32>
    %cst_6 = arith.constant 0.707106769 : f32
    %8 = vector.broadcast %cst_6 : f32 to vector<8x128xf32>
    %9 = arith.mulf %5, %8 : vector<8x128xf32>
    %10 = math.erf %9 : vector<8x128xf32>
    %cst_7 = arith.constant 1.000000e+00 : f32
    %11 = vector.broadcast %cst_7 : f32 to vector<8x128xf32>
    %12 = arith.addf %11, %10 : vector<8x128xf32>
    %13 = arith.mulf %7, %12 : vector<8x128xf32>
    %c0_8 = arith.constant 0 : index
    %c0_9 = arith.constant 0 : index
    %14 = vector.load %arg4[%c0_8, %c0_9] : memref<128x128xf32, #tpu.memory_space<vmem>>, vector<128x128xf32>
    %cst_10 = arith.constant dense<0.000000e+00> : vector<8x128xf32>
    %15 = tpu.matmul %13, %14, %cst_10 {dimension_numbers = #tpu.dot_dimension_numbers<[1], [0], [0], [1], [0, 0, 1, 1], [], []>, precision = #tpu.contract_precision<fp32>} : vector<8x128xf32>, vector<128x128xf32>, vector<8x128xf32> -> vector<8x128xf32>
    %c0_11 = arith.constant 0 : index
    %c0_12 = arith.constant 0 : index
    %16 = vector.load %arg5[%c0_11, %c0_12] : memref<1x128xf32, #tpu.memory_space<vmem>>, vector<1x128xf32>
    %c0_13 = arith.constant 0 : index
    %c0_14 = arith.constant 0 : index
    %17 = vector.load %arg6[%c0_13, %c0_14] : memref<1x128xf32, #tpu.memory_space<vmem>>, vector<1x128xf32>
    %c0_15 = arith.constant 0 : index
    %c0_16 = arith.constant 0 : index
    %18 = vector.load %arg7[%c0_15, %c0_16] : memref<1x128xf32, #tpu.memory_space<vmem>>, vector<1x128xf32>
    %19 = arith.addf %0, %15 : vector<8x128xf32>
    %20 = vector.broadcast %16 : vector<1x128xf32> to vector<8x128xf32>
    %21 = arith.addf %19, %20 : vector<8x128xf32>
    %cst_17 = arith.constant dense<0.000000e+00> : vector<8xf32>
    %22 = vector.multi_reduction <add>, %21, %cst_17 [1] : vector<8x128xf32> to vector<8xf32>
    %23 = vector.shape_cast %22 : vector<8xf32> to vector<8x1xf32>
    %cst_18 = arith.constant 3.125000e-02 : f32
    %24 = vector.broadcast %cst_18 : f32 to vector<8x1xf32>
    %25 = arith.mulf %23, %24 : vector<8x1xf32>
    %26 = vector.broadcast %25 : vector<8x1xf32> to vector<8x128xf32>
    %27 = arith.subf %21, %26 : vector<8x128xf32>
    %28 = tpu.iota {dimensions = array<i32: 1>} : vector<8x128xi32>
    %c32_i32 = arith.constant 32 : i32
    %29 = vector.broadcast %c32_i32 : i32 to vector<8x128xi32>
    %30 = arith.cmpi slt, %28, %29 : vector<8x128xi32>
    %cst_19 = arith.constant 0.000000e+00 : f32
    %31 = vector.broadcast %cst_19 : f32 to vector<8x128xf32>
    %32 = arith.select %30, %27, %31 : vector<8x128xi1>, vector<8x128xf32>
    %33 = arith.mulf %32, %32 : vector<8x128xf32>
    %cst_20 = arith.constant dense<0.000000e+00> : vector<8xf32>
    %34 = vector.multi_reduction <add>, %33, %cst_20 [1] : vector<8x128xf32> to vector<8xf32>
    %35 = vector.shape_cast %34 : vector<8xf32> to vector<8x1xf32>
    %cst_21 = arith.constant 3.125000e-02 : f32
    %36 = vector.broadcast %cst_21 : f32 to vector<8x1xf32>
    %37 = arith.mulf %35, %36 : vector<8x1xf32>
    %cst_22 = arith.constant 9.99999997E-7 : f32
    %38 = vector.broadcast %cst_22 : f32 to vector<8x1xf32>
    %39 = arith.addf %37, %38 : vector<8x1xf32>
    %40 = math.rsqrt %39 : vector<8x1xf32>
    %41 = vector.broadcast %40 : vector<8x1xf32> to vector<8x128xf32>
    %42 = arith.mulf %32, %41 : vector<8x128xf32>
    %43 = vector.broadcast %17 : vector<1x128xf32> to vector<8x128xf32>
    %44 = arith.mulf %42, %43 : vector<8x128xf32>
    %45 = vector.broadcast %18 : vector<1x128xf32> to vector<8x128xf32>
    %46 = arith.addf %44, %45 : vector<8x128xf32>
    %c0_23 = arith.constant 0 : index
    %c0_24 = arith.constant 0 : index
    %47 = vector.load %arg8[%c0_23, %c0_24] : memref<8x128xf32, #tpu.memory_space<vmem>>, vector<8x128xf32>
    tpu.vector_store %arg8[%c0_23, %c0_24], %46 {strides = array<i32>} : memref<8x128xf32, #tpu.memory_space<vmem>>, vector<8x128xf32>,
    return
  }
  func.func @transform_0(%arg0: i32) -> (i32, i32) {
    %c0_i32 = arith.constant 0 : i32
    %c0_i32_0 = arith.constant 0 : i32
    return %arg0, %c0_i32 : i32, i32
  }
  func.func @transform_1(%arg0: i32) -> (i32, i32) {
    %c0_i32 = arith.constant 0 : i32
    %c0_i32_0 = arith.constant 0 : i32
    %c0_i32_1 = arith.constant 0 : i32
    return %c0_i32, %c0_i32_0 : i32, i32
  }
  func.func @transform_2(%arg0: i32) -> (i32, i32) {
    %c0_i32 = arith.constant 0 : i32
    %c0_i32_0 = arith.constant 0 : i32
    %c0_i32_1 = arith.constant 0 : i32
    return %c0_i32, %c0_i32_0 : i32, i32
  }
  func.func @transform_3(%arg0: i32) -> (i32, i32) {
    %c0_i32 = arith.constant 0 : i32
    %c0_i32_0 = arith.constant 0 : i32
    %c0_i32_1 = arith.constant 0 : i32
    return %c0_i32, %c0_i32_0 : i32, i32
  }
  func.func @transform_4(%arg0: i32) -> (i32, i32) {
    %c0_i32 = arith.constant 0 : i32
    %c0_i32_0 = arith.constant 0 : i32
    %c0_i32_1 = arith.constant 0 : i32
    return %c0_i32, %c0_i32_0 : i32, i32
  }
  func.func @transform_5(%arg0: i32) -> (i32, i32) {
    %c0_i32 = arith.constant 0 : i32
    %c0_i32_0 = arith.constant 0 : i32
    %c0_i32_1 = arith.constant 0 : i32
    return %c0_i32, %c0_i32_0 : i32, i32
  }
  func.func @transform_6(%arg0: i32) -> (i32, i32) {
    %c0_i32 = arith.constant 0 : i32
    %c0_i32_0 = arith.constant 0 : i32
    %c0_i32_1 = arith.constant 0 : i32
    return %c0_i32, %c0_i32_0 : i32, i32
  }
  func.func @transform_7(%arg0: i32) -> (i32, i32) {
    %c0_i32 = arith.constant 0 : i32
    %c0_i32_0 = arith.constant 0 : i32
    return %arg0, %c0_i32 : i32, i32
  }
}

</mosaic_0001>

<bundles_post_ra>
// kernel: tpu_custom_call.1
= control target key start
LH: loop header
LB: loop body
LE: loop exit
PB: predicated region body
PF: predicated region fallthrough
CT: control target
= control target key end

     0   :  { %s3619_s0 = inlined_call_operand.hbm [shape: f32[16,128], index: 0, kind: input, shape index: {}]   ;;  %s3620_s1 = inlined_call_operand.hbm [shape: f32[128,128], index: 1, kind: input, shape index: {}]   ;;  %s3621_s2 = inlined_call_operand.vmem [shape: f32[1,128], index: 2, kind: input, shape index: {}]   ;;  %s3622_s3 = inlined_call_operand.hbm [shape: f32[128,128], index: 3, kind: input, shape index: {}]   ;;  %s3623_s4 = inlined_call_operand.vmem [shape: f32[1,128], index: 4, kind: input, shape index: {}]   ;;  %s3624_s5 = inlined_call_operand.vmem [shape: f32[1,128], index: 5, kind: input, shape index: {}]   ;;  %s3625_s6 = inlined_call_operand.vmem [shape: f32[1,128], index: 6, kind: input, shape index: {}]   ;;  %s3626_s7 = inlined_call_operand.hbm [shape: f32[16,128], index: 7, kind: output, shape index: {}]  }
   0x1   :  { %3638 = sst [smem:[#allocation12_spill]] %s3620_s1 }
   0x2   :  { %3639 = sst [smem:[#allocation13_spill]] %s3622_s3 }
   0x3   :  { %12 = vsyncpa [#allocation3], 0 }
   0x4   :  { %14 = vsyncpa [#allocation3 + $0x1], 0 }
   0x5   :  { %15 = vsyncpa [#allocation6], 0 }
   0x6   :  { %16 = vsyncpa [#allocation4], 0 }
   0x7   :  { %18 = vsyncpa [#allocation4 + $0x1], 0  ;;  %s2712_s24 = smov 0   ;;  %s2714_s25 = smov 0  }
   0x8   :  { %s2716_s26 = smov 0   ;;  %s2718_s27 = smov 0  }
   0x9 LB: > { %s2733_s28 = sadd.s32 4294967295, %s2662_s27   ;;  %s1794_s29 = sadd.s32 4294967294, %s2662_s27   ;;  %s2662_s27 = sphi %s2718_s27, %s3666_s27   ;;  %s2658_s26 = sphi %s2716_s26, %s3665_s26   ;;  %s2654_s25 = sphi %s2714_s25, %s3664_s25   ;;  %s2650_s24 = sphi %s2712_s24, %s3663_s24  }
   0xa   : > { %p44_p0 = scmp.ne.s32.totalorder %s2654_s25, %s2650_s24  ;;  %p3627_p1 = scmp.eq.s32.totalorder %s2733_s28, 0 }
   0xb   : > { %p200_p3 = scmp.eq.s32.totalorder %s1794_s29, 1  ;;  %p1795_p5 = scmp.ge.s32.totalorder %s2662_s27, 1 }
   0xc   : > { %p2742_p4 = por %p3627_p1, %p44_p0  ;;  %p207_p7 = scmp.lt.s32.totalorder %s2662_s27, 3 }
   0xd   : > { %p2747_p6 = por %p200_p3, %p44_p0  ;;  %s2664_s10 = smov [#allocation5]  }
   0xe   : > { %s3640_s30 = scalar_select %p2742_p4, 1, 0 }
   0xf   : > { %s3641_s8 = scalar_select %p2747_p6, 1, 0 }
  0x10   : > { %p2752_p8 = pnand %p1795_p5, %p207_p7  ;;  %s219_s11 = sshll.u32 %s2664_s10, 4  ;;  %s220_s11 = int_to_ptr.vmem [resolvable:$true] %s219_s11 }
  0x11   : > { %s2665_s13 = smov [#allocation7]   ;;  %s2525_s15 = scalar_lea.vmem %s220_s11, 2048 }
  0x12   : > { %s3642_s9 = scalar_select %p2752_p8, 1, 0 }
  0x13   : > { %p2450_p9 = pneg %p2752_p8  ;;  %s235_s14 = sshll.u32 %s2665_s13, 4  ;;  %s236_s14 = int_to_ptr.vmem [resolvable:$true] %s235_s14 }
  0x14   : > { %p2526_p13 = scmp.ne.s32.totalorder %s220_s11, %s2525_s15  ;;  %p2533_p5 = scmp.lt.s32.totalorder %s220_s11, %s220_s11 }
  0x15   : > { %p2761_p11 = pnand %p2450_p9, %p3627_p1  ;;  %p2534_p7 = scmp.lt.s32.totalorder %s2525_s15, %s2525_s15 }
  0x17   : > { %p2516_p12 = pneg %p2761_p11  ;;  %p2535_p10 = por %p2534_p7, %p2533_p5 }
  0x19   : > { %p2528_p0 = pnand %p2526_p13, %p2516_p12 }
  0x1b   : > { %p2529_p3 = pneg %p2528_p0 }
  0x1d   : > { %p2536_p9 = pnand %p2535_p10, %p2529_p3 }
  0x1f   : > { %2539 = shalt.err (!%p2536_p9)
}
  0x20   : > { %s2666_s16 = smov 128   ;;  %s2667_s17 = smov 8  }
  0x21   : > { %s3644_s1 = sld [smem:[#allocation12_spill]]  ;;  %s2551_s20 = scalar_lea.vmem %s236_s14, 2048 }
  0x22   : > { %p2552_p1 = scmp.ne.s32.totalorder %s236_s14, %s2551_s20  ;;  %p2559_p2 = scmp.lt.s32.totalorder %s236_s14, %s236_s14 }
  0x23   : > { %p2560_p6 = scmp.lt.s32.totalorder %s2551_s20, %s2551_s20 }
  0x24   : > { %p2554_p13 = pnand %p2552_p1, %p2516_p12 }
  0x25   : > { %p2561_p5 = por %p2560_p6, %p2559_p2 }
  0x26   : > { %p2555_p0 = pneg %p2554_p13 }
  0x27   : > { %2453 = dma.hbm_to_vmem [thread:$0]  (!%p2761_p11), %s3644_s1, 2048, %s220_s11, [#allocation6], %s2666_s16, %s2666_s16, %s2667_s17  }
  0x28   : > { %p2562_p10 = pnand %p2561_p5, %p2555_p0 }
  0x2a   : > { %2565 = shalt.err (!%p2562_p10)
}
  0x2b   : > { %s3645_s3 = sld [smem:[#allocation13_spill]]  ;;  %s2784_s23 = sadd.s32 1, %s2662_s27  }
  0x2c   : > { %s31_s29 = sadd.s32 1, %s2658_s26  ;;  %s28_s10 = ssub.s32 %s2662_s27, %s2784_s23 }
  0x2d   : > { %p38_p1 = scmp.ne.s32.totalorder %s2658_s26, %s2654_s25  ;;  %p29_p2 = scmp.eq.s32.totalorder %s28_s10, 0 }
  0x2e   : > { %p39_p6 = scmp.eq.s32.totalorder %s2662_s27, 0  ;;  %p3646_p12 = scmp.eq.s32.totalorder %s2733_s28, 1 }
  0x2f   : > { %p2467_p7 = scmp.lt.s32.totalorder %s2662_s27, 2  ;;  %s258_s13 = sand.u32 1, %s2658_s26  }
  0x30   : > { %p2794_p3 = por %p3646_p12, %p38_p1  ;;  %p40_p9 = por %p39_p6, %p38_p1 }
  0x31   : > { %2456 = dma.hbm_to_vmem [thread:$0]  (!%p2761_p11), %s3645_s3, 2048, %s236_s14, [#allocation6], %s2666_s16, %s2666_s16, %s2667_s17  }
  0x32   : > { %s3647_s11 = scalar_select %p2794_p3, 1, 0 }
  0x33   : > { %s2800_s12 = scalar_select %p29_p2, %s2658_s26, %s31_s29  }
  0x34   : > { %s1799_s15 = sshll.u32 %s258_s13, 3  ;;  %s1800_s14 = sshll.u32 %s2662_s27, 7 }
  0x35   : > { %s2807_s18 = scalar_lea.hbm %s3619_s0, %s1800_s14  ;;  %s262_s19 = scalar_lea.vmem [#allocation2], %s1799_s15 }
  0x36   : > { %s269_s20 = sshll.u32 %s262_s19, 4  ;;  %p2809_p11 = pnand %p2467_p7, %p40_p9  ;;  %s270_s20 = int_to_ptr.vmem [resolvable:$true] %s269_s20 }
  0x37   : > { %s259_s22 = scalar_lea.sflag [#allocation3], %s258_s13  ;;  %s2566_s29 = scalar_lea.hbm %s2807_s18, 128 }
  0x38   : > { %p2567_p13 = scmp.ne.s32.totalorder %s2807_s18, %s2566_s29  ;;  %p2568_p0 = pneg %p2809_p11 }
  0x39   : > { %s2571_s16 = scalar_lea.hbm %s3619_s0, 256  ;;  %p2572_p1 = scmp.lt.s32.totalorder %s2807_s18, %s3619_s0 }
  0x3a   : > { %p2569_p5 = pnand %p2568_p0, %p2567_p13  ;;  %p2573_p2 = scmp.lt.s32.totalorder %s2571_s16, %s2566_s29 }
  0x3c   : > { %p2570_p10 = pneg %p2569_p5  ;;  %p2574_p6 = por %p2573_p2, %p2572_p1 }
  0x3e   : > { %p2575_p12 = pnand %p2574_p6, %p2570_p10 }
  0x40   : > { %2578 = shalt.err (!%p2575_p12)
}
  0x41   : > { %s2579_s19 = scalar_lea.vmem %s270_s20, 128  ;;  %s2668_s13 = smov [#allocation2]  }
  0x42   : > { %p2580_p7 = scmp.ne.s32.totalorder %s270_s20, %s2579_s19  ;;  %s2584_s1 = sshll.u32 %s2668_s13, 4  ;;  %s2585_s1 = int_to_ptr.vmem [resolvable:$false] %s2584_s1 }
  0x43   : > { %s2586_s3 = scalar_lea.vmem %s2585_s1, 256  ;;  %p2587_p13 = scmp.lt.s32.totalorder %s270_s20, %s2585_s1 }
  0x44   : > { %p2582_p9 = pnand %p2580_p7, %p2568_p0  ;;  %p2588_p5 = scmp.lt.s32.totalorder %s2586_s3, %s2579_s19 }
  0x46   : > { %p2583_p3 = pneg %p2582_p9  ;;  %p2589_p4 = por %p2588_p5, %p2587_p13 }
  0x48   : > { %p2590_p8 = pnand %p2589_p4, %p2583_p3 }
  0x4a   : > { %2593 = shalt.err (!%p2590_p8)
}
  0x4b   : > { %2460 = dma.hbm_to_vmem [thread:$0]  (!%p2809_p11), %s2807_s18, 128, %s270_s20, %s259_s22  }
  0x4c   : > { %p3649_p10 = scmp.ne.s32.totalorder %s3642_s9, 0 }
  0x4d   : > { %s2830_s29 = sand.u32 (!%p3649_p10), 1, %s2654_s25   ;;  %p3650_p4 = scmp.ne.s32.totalorder (!%p3649_p10), %s3640_s30, 0 }
  0x4e   : > { %278 = sbr.rel (%p3649_p10) target bundleno = 1009 (0x3f1), region = 48  ;;  %s1802_s10 = sshll.u32 (!%p3649_p10), %s2830_s29, 3 }
  0x4f   : > { %s281_s1 = scalar_lea.sflag (!%p3649_p10), [#allocation3], %s2830_s29  ;;  %s2836_s3 = scalar_lea.vmem (!%p3649_p10), [#allocation2], %s1802_s10 }
  0x53   : > { %2637 = dma.done.wait (%p3650_p4), %s281_s1, 128  }
  0x54   : > { %2639 = vsyncadd (%p3650_p4), %s281_s1, 4294967168  ;;  %p3651_p8 = scmp.eq.s32.totalorder %s2733_s28, 0 }
  0x56   : > { %2641 = dma.done.wait (%p3651_p8), [#allocation6], 4096   ;;  %p3652_p3 = pmov %p3651_p8 }
  0x57   : > { %v2669_v0 = vmov 0.0   ;;  %vm2670_vm0 = vmmov 0   ;;  %v339_v1 = vld [vmem:[#allocation5 + $0x78] sm:$0xff]  ;;  %v338_v2 = vld [vmem:[#allocation5 + $0x70] sm:$0xff]  ;;  %v337_v3 = vld [vmem:[#allocation5 + $0x68] sm:$0xff]  ;;  %s1811_s17 = sshll.u32 %s2733_s28, 7 }
  0x58   : > { %2643 = vsyncadd (%p3652_p3), [#allocation6], 4294963200  ;;  %2018 = vmatprep.subr.mxu0 %v2669_v0  ;;  %2053 = vmatprep.subr.mxu1 %v2669_v0  ;;  %v2852_v4 = vand.u32 4294901760, %v339_v1  ;;  %v2854_v5 = vand.u32 4294901760, %v338_v2  ;;  %v2856_v6 = vand.u32 4294901760, %v337_v3  ;;  %v336_v7 = vld [vmem:[#allocation5 + $0x60] sm:$0xff] }
  0x59   : > { %2050 = vmatprep.mubr.msk.f32.mxu0 %vm2670_vm0, %v2669_v0  ;;  %2085 = vmatprep.mubr.msk.f32.mxu1 %vm2670_vm0, %v2669_v0  ;;  %v335_v8 = vld [vmem:[#allocation5 + $0x58] sm:$0xff]  ;;  %v334_v9 = vld [vmem:[#allocation5 + $0x50] sm:$0xff]  ;;  %v2858_v10 = vand.u32 4294901760, %v336_v7  ;;  %v333_v13 = vld [vmem:[#allocation5 + $0x48] sm:$0xff]  ;;  %s322_s15 = scalar_lea.vmem [#allocation8], %s1802_s10  ;;  %s1692_s30 = scalar_lea.sflag [#allocation4], %s2830_s29 }
  0x5a   : > { %v2860_v11 = vand.u32 4294901760, %v335_v8  ;;  %v2862_v12 = vand.u32 4294901760, %v334_v9  ;;  %v332_v14 = vld [vmem:[#allocation5 + $0x40] sm:$0xff]  ;;  %2019 = vmatpush3.msra.mxu0 %v2852_v4  ;;  %v2866_v15 = vsub.f32 %v339_v1, %v2852_v4  ;;  %v2869_v16 = vsub.f32 %v338_v2, %v2854_v5  ;;  %v331_v19 = vld [vmem:[#allocation5 + $0x38] sm:$0xff]  ;;  %v330_v26 = vld [vmem:[#allocation5 + $0x30] sm:$0xff]  ;;  %s1705_s19 = sshll.u32 %s322_s15, 4  ;;  %s1706_s19 = int_to_ptr.vmem [resolvable:$true] %s1705_s19 }
  0x5b   : > { %v2871_v17 = vand.u32 4294901760, %v333_v13  ;;  %v2874_v18 = vsub.f32 %v337_v3, %v2856_v6  ;;  %2020 = vmatprep.subr.mxu0 %v2669_v0  ;;  %v2878_v20 = vsub.f32 %v336_v7, %v2858_v10  ;;  %v2887_v25 = vand.u32 4294901760, %v332_v14  ;;  %v329_v36 = vld [vmem:[#allocation5 + $0x28] sm:$0xff]  ;;  %v328_v41 = vld [vmem:[#allocation5 + $0x20] sm:$0xff]  ;;  %v327_v49 = vld [vmem:[#allocation5 + $0x18] sm:$0xff]  ;;  %s2594_s9 = scalar_lea.vmem %s1706_s19, 128 }
  0x5c   : > { %v2881_v21 = vsub.f32 %v335_v8, %v2860_v11  ;;  %2021 = vmatpush3.msra.mxu0 %v2854_v5  ;;  %v441_v22 = vand.u32 4294901760, %v2866_v15  ;;  %v448_v23 = vand.u32 4294901760, %v2869_v16  ;;  %v2891_v28 = vand.u32 4294901760, %v331_v19  ;;  %v323_v50 = vld [vmem:[%s2836_s3] sm:$0xff]  ;;  %v325_v60 = vld [vmem:[#allocation5 + $0x8] sm:$0xff]  ;;  %v324_v7 = vld [vmem:[#allocation5] sm:$0xff]  ;;  %p2595_p11 = scmp.ne.s32.totalorder %s1706_s19, %s2594_s9 }
  0x5d   : > { %v455_v24 = vand.u32 4294901760, %v2874_v18  ;;  %2022 = vmatprep.subr.mxu0 %v2669_v0  ;;  %v462_v27 = vand.u32 4294901760, %v2878_v20  ;;  %v2895_v30 = vsub.f32 %v334_v9, %v2862_v12  ;;  %v2908_v34 = vsub.f32 %v333_v13, %v2871_v17  ;;  %v326_v54 = vld [vmem:[#allocation5 + $0x10] sm:$0xff]  ;;  %p3660_p0 = scmp.ne.s32.totalorder %s3647_s11, 0  ;;  %s2671_s18 = smov [#allocation8]  }
  0x5e   : > { %v469_v29 = vand.u32 4294901760, %v2881_v21  ;;  %2023 = vmatpush3.msra.mxu0 %v2856_v6  ;;  %v442_v31 = vsub.f32 %v2866_v15, %v441_v22  ;;  %v449_v32 = vsub.f32 %v2869_v16, %v448_v23  ;;  %v2911_v35 = vand.u32 4294901760, %v330_v26  ;;  %s2598_s20 = sshll.u32 %s2671_s18, 4  ;;  %s2599_s20 = int_to_ptr.vmem [resolvable:$false] %s2598_s20 }
  0x5f   : > { %v456_v33 = vsub.f32 %v2874_v18, %v455_v24  ;;  %2024 = vmatprep.subr.mxu0 %v2669_v0  ;;  %v463_v39 = vsub.f32 %v2878_v20, %v462_v27  ;;  %v476_v40 = vand.u32 4294901760, %v2895_v30  ;;  %v2923_v43 = vsub.f32 %v332_v14, %v2887_v25  ;;  %p2596_p1 = pnand %p2595_p11, %p3660_p0  ;;  %s2600_s28 = scalar_lea.vmem %s2599_s20, 256 }
  0x60   : > { %2025 = vmatpush3.msra.mxu0 %v2858_v10  ;;  %v443_v37 = vand.u32 4294901760, %v442_v31  ;;  %v450_v38 = vand.u32 4294901760, %v449_v32  ;;  %v470_v42 = vsub.f32 %v2881_v21, %v469_v29  ;;  %v2926_v45 = vand.u32 4294901760, %v329_v36  ;;  %p2601_p6 = scmp.lt.s32.totalorder %s1706_s19, %s2599_s20  ;;  %p2602_p12 = scmp.lt.s32.totalorder %s2600_s28, %s2594_s9 }
  0x61   : > { %2026 = vmatprep.subr.mxu0 %v2669_v0  ;;  %v457_v44 = vand.u32 4294901760, %v456_v33  ;;  %v483_v46 = vand.u32 4294901760, %v2908_v34  ;;  %v2930_v47 = vsub.f32 %v331_v19, %v2891_v28  ;;  %v2934_v48 = vand.u32 4294901760, %v328_v41  ;;  %p2597_p2 = pneg %p2596_p1 }
  0x62   : > { %2027 = vmatpush3.msra.mxu0 %v2860_v11  ;;  %2054 = vmatpush3.msra.mxu1 %v443_v37  ;;  %v464_v51 = vand.u32 4294901760, %v463_v39  ;;  %v477_v52 = vsub.f32 %v2895_v30, %v476_v40  ;;  %v490_v53 = vand.u32 4294901760, %v2923_v43  ;;  %v2943_v55 = vsub.f32 %v330_v26, %v2911_v35  ;;  %p2603_p7 = por %p2602_p12, %p2601_p6 }
  0x63   : > { %2028 = vmatprep.subr.mxu0 %v2669_v0  ;;  %2055 = vmatprep.subr.mxu1 %v2669_v0  ;;  %v471_v56 = vand.u32 4294901760, %v470_v42  ;;  %v497_v57 = vand.u32 4294901760, %v2930_v47  ;;  %v484_v58 = vsub.f32 %v2908_v34, %v483_v46  ;;  %v2952_v59 = vand.u32 4294901760, %v327_v49 }
  0x64   : > { %2029 = vmatpush3.msra.mxu0 %v2862_v12  ;;  %2056 = vmatpush3.msra.mxu1 %v450_v38  ;;  %v2955_v61 = vsub.f32 %v329_v36, %v2926_v45  ;;  %v2957_v62 = vand.u32 4294901760, %v323_v50  ;;  %v2961_v63 = vand.u32 4294901760, %v326_v54  ;;  %v478_v1 = vand.u32 4294901760, %v477_v52  ;;  %p2604_p9 = pnand %p2603_p7, %p2597_p2 }
  0x65   : > { %2030 = vmatprep.subr.mxu0 %v2669_v0  ;;  %2057 = vmatprep.subr.mxu1 %v2669_v0  ;;  %v491_v2 = vsub.f32 %v2923_v43, %v490_v53  ;;  %v504_v3 = vand.u32 4294901760, %v2943_v55  ;;  %v2969_v8 = vsub.f32 %v328_v41, %v2934_v48  ;;  %v498_v9 = vsub.f32 %v2930_v47, %v497_v57 }
  0x66   : > { %2031 = vmatpush3.msra.mxu0 %v2871_v17  ;;  %2058 = vmatpush3.msra.mxu1 %v457_v44  ;;  %v2976_v13 = vand.u32 4294901760, %v325_v60  ;;  %v485_v14 = vand.u32 4294901760, %v484_v58  ;;  %v511_v19 = vand.u32 4294901760, %v2955_v61  ;;  %v2981_v26 = vsub.f32 %v323_v50, %v2957_v62 }
  0x67   : > { %2032 = vmatprep.subr.mxu0 %v2669_v0  ;;  %2059 = vmatprep.subr.mxu1 %v2669_v0  ;;  %v2984_v31 = vsub.f32 %v327_v49, %v2952_v59  ;;  %v2988_v32 = vand.u32 4294901760, %v324_v7  ;;  %v492_v33 = vand.u32 4294901760, %v491_v2  ;;  %v505_v36 = vsub.f32 %v2943_v55, %v504_v3 }
  0x68   : > { %2033 = vmatpush3.msra.mxu0 %v2887_v25  ;;  %2060 = vmatpush3.msra.mxu1 %v464_v51  ;;  %v518_v37 = vand.u32 4294901760, %v2969_v8  ;;  %v2996_v38 = vsub.f32 %v326_v54, %v2961_v63  ;;  %v499_v39 = vand.u32 4294901760, %v498_v9  ;;  %v512_v41 = vsub.f32 %v2955_v61, %v511_v19 }
  0x69   : > { %2034 = vmatprep.subr.mxu0 %v2669_v0  ;;  %2061 = vmatprep.subr.mxu1 %v2669_v0  ;;  %v430_v42 = vand.u32 4294901760, %v2981_v26  ;;  %v525_v44 = vand.u32 4294901760, %v2984_v31  ;;  %v3007_v49 = vsub.f32 %v325_v60, %v2976_v13  ;;  %v506_v50 = vand.u32 4294901760, %v505_v36 }
  0x6a   : > { %2035 = vmatpush3.msra.mxu0 %v2891_v28  ;;  %2062 = vmatpush3.msra.mxu1 %v471_v56  ;;  %v519_v51 = vsub.f32 %v2969_v8, %v518_v37  ;;  %v532_v52 = vand.u32 4294901760, %v2996_v38  ;;  %v3017_v54 = vsub.f32 %v324_v7, %v2988_v32  ;;  %v513_v56 = vand.u32 4294901760, %v512_v41 }
  0x6b   : > { %2036 = vmatprep.subr.mxu0 %v2669_v0  ;;  %2063 = vmatprep.subr.mxu1 %v2669_v0  ;;  %v431_v58 = vsub.f32 %v2981_v26, %v430_v42  ;;  %v526_v60 = vsub.f32 %v2984_v31, %v525_v44 }
  0x6c   : > { %2037 = vmatpush3.msra.mxu0 %v2911_v35  ;;  %2064 = vmatpush3.msra.mxu1 %v478_v1  ;;  %v539_v1 = vand.u32 4294901760, %v3007_v49  ;;  %v520_v2 = vand.u32 4294901760, %v519_v51  ;;  %v533_v7 = vsub.f32 %v2996_v38, %v532_v52  ;;  %v546_v9 = vand.u32 4294901760, %v3017_v54 }
  0x6d   : > { %2038 = vmatprep.subr.mxu0 %v2669_v0  ;;  %2065 = vmatprep.subr.mxu1 %v2669_v0 }
  0x6e   : > { %2039 = vmatpush3.msra.mxu0 %v2926_v45  ;;  %2066 = vmatpush3.msra.mxu1 %v485_v14  ;;  %v432_v14 = vand.u32 4294901760, %v431_v58  ;;  %v540_v36 = vsub.f32 %v3007_v49, %v539_v1  ;;  %v547_v41 = vsub.f32 %v3017_v54, %v546_v9  ;;  %v998_v58 = vld [vmem:[#allocation7 + $0x28] sm:$0xff] }
  0x6f   : > { %2040 = vmatprep.subr.mxu0 %v2669_v0  ;;  %2067 = vmatprep.subr.mxu1 %v2669_v0 }
  0x70   : > { %2041 = vmatpush3.msra.mxu0 %v2934_v48  ;;  %2068 = vmatpush3.msra.mxu1 %v492_v33  ;;  %v527_v33 = vand.u32 4294901760, %v526_v60  ;;  %v548_v51 = vand.u32 4294901760, %v547_v41 }
  0x71   : > { %2042 = vmatprep.subr.mxu0 %v2669_v0  ;;  %2069 = vmatprep.subr.mxu1 %v2669_v0 }
  0x72   : > { %2043 = vmatpush3.msra.mxu0 %v2952_v59  ;;  %2070 = vmatpush3.msra.mxu1 %v499_v39  ;;  %v534_v39 = vand.u32 4294901760, %v533_v7  ;;  %v3318_v7 = vand.u32 4294901760, %v998_v58 }
  0x73   : > { %2044 = vmatprep.subr.mxu0 %v2669_v0  ;;  %2071 = vmatprep.subr.mxu1 %v2669_v0 }
  0x74   : > { %2045 = vmatpush3.msra.mxu0 %v2961_v63  ;;  %2072 = vmatpush3.msra.mxu1 %v506_v50  ;;  %v541_v50 = vand.u32 4294901760, %v540_v36 }
  0x75   : > { %2046 = vmatprep.subr.mxu0 %v2669_v0  ;;  %2073 = vmatprep.subr.mxu1 %v2669_v0 }
  0x76   : > { %2047 = vmatpush3.msra.mxu0 %v2976_v13  ;;  %2074 = vmatpush3.msra.mxu1 %v513_v56 }
  0x77   : > { %2048 = vmatprep.subr.mxu0 %v2669_v0  ;;  %2075 = vmatprep.subr.mxu1 %v2669_v0 }
  0x78   : > { %2049 = vmatpush3.msra.mxu0 %v2988_v32  ;;  %2076 = vmatpush3.msra.mxu1 %v520_v2 }
  0x79   : > { %2077 = vmatprep.subr.mxu1 %v2669_v0  ;;  %2088 = vmatprep.subr.mxu0 %v2669_v0 }
  0x7a   : > { %2051 = vmatmul.mubr.f32.vlgmr.msra.gmra.mxu0 %v432_v14  ;;  %2078 = vmatpush3.msra.mxu1 %v527_v33  ;;  %v997_v14 = vld [vmem:[#allocation7 + $0x20] sm:$0xff] }
  0x7b   : > { %2089 = vmatpush3.msra.mxu0 %v2866_v15  ;;  %2079 = vmatprep.subr.mxu1 %v2669_v0  ;;  %v3332_v41 = vand.u32 4294901760, %v997_v14 }
  0x7c   : > { %2090 = vmatprep.subr.mxu0 %v2669_v0  ;;  %2080 = vmatpush3.msra.mxu1 %v534_v39  ;;  %v3330_v39 = vsub.f32 %v998_v58, %v3318_v7 }
  0x7d   : > { %2091 = vmatpush3.msra.mxu0 %v2869_v16  ;;  %2081 = vmatprep.subr.mxu1 %v2669_v0 }
  0x7e   : > { %2092 = vmatprep.subr.mxu0 %v2669_v0  ;;  %2082 = vmatpush3.msra.mxu1 %v541_v50 }
  0x7f   : > { %2093 = vmatpush3.msra.mxu0 %v2874_v18  ;;  %2083 = vmatprep.subr.mxu1 %v2669_v0  ;;  %v1005_v18 = vld [vmem:[#allocation7 + $0x60] sm:$0xff] }
  0x80   : > { %2094 = vmatprep.subr.mxu0 %v2669_v0  ;;  %2084 = vmatpush3.msra.mxu1 %v548_v51  ;;  %v996_v51 = vld [vmem:[#allocation7 + $0x18] sm:$0xff] }
  0x81   : > { %2095 = vmatpush3.msra.mxu0 %v2878_v20  ;;  %2086 = vmatmul.mubr.f32.vlgmr.msra.gmra.mxu1 %v2957_v62 }
  0x82   : > { %2096 = vmatprep.subr.mxu0 %v2669_v0  ;;  %2123 = vmatprep.subr.mxu1 %v2669_v0 }
  0x83   : > { %2097 = vmatpush3.msra.mxu0 %v2881_v21  ;;  %2124 = vmatpush3.msra.mxu1 %v2852_v4 }
  0x84   : > { %2098 = vmatprep.subr.mxu0 %v2669_v0  ;;  %2125 = vmatprep.subr.mxu1 %v2669_v0 }
  0x85   : > { %2099 = vmatpush3.msra.mxu0 %v2895_v30  ;;  %2126 = vmatpush3.msra.mxu1 %v2854_v5 }
  0x86   : > { %2100 = vmatprep.subr.mxu0 %v2669_v0  ;;  %2127 = vmatprep.subr.mxu1 %v2669_v0 }
  0x87   : > { %2101 = vmatpush3.msra.mxu0 %v2908_v34  ;;  %2128 = vmatpush3.msra.mxu1 %v2856_v6  ;;  %v1003_v34 = vld [vmem:[#allocation7 + $0x50] sm:$0xff] }
  0x88   : > { %2102 = vmatprep.subr.mxu0 %v2669_v0  ;;  %2129 = vmatprep.subr.mxu1 %v2669_v0 }
  0x89   : > { %2103 = vmatpush3.msra.mxu0 %v2923_v43  ;;  %2130 = vmatpush3.msra.mxu1 %v2858_v10 }
  0x8a   : > { %2104 = vmatprep.subr.mxu0 %v2669_v0  ;;  %2131 = vmatprep.subr.mxu1 %v2669_v0 }
  0x8b   : > { %2105 = vmatpush3.msra.mxu0 %v2930_v47  ;;  %2132 = vmatpush3.msra.mxu1 %v2860_v11  ;;  %v1002_v47 = vld [vmem:[#allocation7 + $0x48] sm:$0xff] }
  0x8c   : > { %2106 = vmatprep.subr.mxu0 %v2669_v0  ;;  %2133 = vmatprep.subr.mxu1 %v2669_v0 }
  0x8d   : > { %2107 = vmatpush3.msra.mxu0 %v2943_v55  ;;  %2134 = vmatpush3.msra.mxu1 %v2862_v12 }
  0x8e   : > { %2108 = vmatprep.subr.mxu0 %v2669_v0  ;;  %2135 = vmatprep.subr.mxu1 %v2669_v0 }
  0x8f   : > { %2109 = vmatpush3.msra.mxu0 %v2955_v61  ;;  %2136 = vmatpush3.msra.mxu1 %v2871_v17  ;;  %v1001_v61 = vld [vmem:[#allocation7 + $0x40] sm:$0xff] }
  0x90   : > { %2110 = vmatprep.subr.mxu0 %v2669_v0  ;;  %2137 = vmatprep.subr.mxu1 %v2669_v0 }
  0x91   : > { %2111 = vmatpush3.msra.mxu0 %v2969_v8  ;;  %2138 = vmatpush3.msra.mxu1 %v2887_v25  ;;  %v3282_v8 = vand.u32 4294901760, %v1001_v61 }
  0x92   : > { %2112 = vmatprep.subr.mxu0 %v2669_v0  ;;  %2139 = vmatprep.subr.mxu1 %v2669_v0 }
  0x93   : > { %2113 = vmatpush3.msra.mxu0 %v2984_v31  ;;  %2140 = vmatpush3.msra.mxu1 %v2891_v28 }
  0x94   : > { %2114 = vmatprep.subr.mxu0 %v2669_v0  ;;  %2141 = vmatprep.subr.mxu1 %v2669_v0 }
  0x95   : > { %2115 = vmatpush3.msra.mxu0 %v2996_v38  ;;  %2142 = vmatpush3.msra.mxu1 %v2911_v35 }
  0x96   : > { %2116 = vmatprep.subr.mxu0 %v2669_v0  ;;  %2143 = vmatprep.subr.mxu1 %v2669_v0 }
  0x97   : > { %2117 = vmatpush3.msra.mxu0 %v3007_v49  ;;  %2144 = vmatpush3.msra.mxu1 %v2926_v45 }
  0x98   : > { %2118 = vmatprep.subr.mxu0 %v2669_v0  ;;  %2145 = vmatprep.subr.mxu1 %v2669_v0 }
  0x99   : > { %2119 = vmatpush3.msra.mxu0 %v3017_v54  ;;  %2120 = vmatprep.mubr.msk.f32.mxu0 %vm2670_vm0, %v2669_v0 }
  0x9a   : > { %2146 = vmatpush3.msra.mxu1 %v2934_v48  ;;  %2121 = vmatmul.mubr.f32.vlgmr.msra.gmra.mxu0 %v2981_v26 }
  0x9b   : > { %2147 = vmatprep.subr.mxu1 %v2669_v0  ;;  %2158 = vmatprep.subr.mxu0 %v2669_v0 }
  0x9c   : > { %2148 = vmatpush3.msra.mxu1 %v2952_v59  ;;  %2159 = vmatpush3.msra.mxu0 %v441_v22 }
  0x9d   : > { %2149 = vmatprep.subr.mxu1 %v2669_v0  ;;  %2160 = vmatprep.subr.mxu0 %v2669_v0 }
  0x9e   : > { %2150 = vmatpush3.msra.mxu1 %v2961_v63  ;;  %2161 = vmatpush3.msra.mxu0 %v448_v23  ;;  %v3240_v23 = vand.u32 4294901760, %v1005_v18 }
  0x9f   : > { %2151 = vmatprep.subr.mxu1 %v2669_v0  ;;  %2162 = vmatprep.subr.mxu0 %v2669_v0 }
  0xa0   : > { %2152 = vmatpush3.msra.mxu1 %v2976_v13  ;;  %2163 = vmatpush3.msra.mxu0 %v455_v24  ;;  %v1004_v24 = vld [vmem:[#allocation7 + $0x58] sm:$0xff] }
  0xa1   : > { %2153 = vmatprep.subr.mxu1 %v2669_v0  ;;  %2164 = vmatprep.subr.mxu0 %v2669_v0  ;;  %v3252_v30 = vand.u32 4294901760, %v1004_v24 }
  0xa2   : > { %2154 = vmatpush3.msra.mxu1 %v2988_v32  ;;  %2155 = vmatprep.mubr.msk.f32.mxu1 %vm2670_vm0, %v2669_v0 }
  0xa3   : > { %2165 = vmatpush3.msra.mxu0 %v462_v27  ;;  %2156 = vmatmul.mubr.f32.vlgmr.msra.gmra.mxu1 %v430_v42  ;;  %v999_v42 = vld [vmem:[#allocation7 + $0x30] sm:$0xff] }
  0xa4   : > { %2166 = vmatprep.subr.mxu0 %v2669_v0  ;;  %2193 = vmatprep.subr.mxu1 %v2669_v0  ;;  %v3310_v56 = vand.u32 4294901760, %v999_v42 }
  0xa5   : > { %2167 = vmatpush3.msra.mxu0 %v469_v29  ;;  %2194 = vmatpush3.msra.mxu1 %v2852_v4  ;;  %v1008_v4 = vld [vmem:[#allocation7 + $0x78] sm:$0xff]  ;;  %v3249_v29 = vsub.f32 %v1005_v18, %v3240_v23  ;;  %v3342_v18 = vand.u32 4294901760, %v996_v51 }
  0xa6   : > { %2168 = vmatprep.subr.mxu0 %v2669_v0  ;;  %2195 = vmatprep.subr.mxu1 %v2669_v0 }
  0xa7   : > { %2169 = vmatpush3.msra.mxu0 %v476_v40  ;;  %2196 = vmatpush3.msra.mxu1 %v2854_v5  ;;  %v3216_v5 = vand.u32 4294901760, %v1008_v4  ;;  %v1124_v43 = vand.u32 4294901760, %v3249_v29 }
  0xa8   : > { %2170 = vmatprep.subr.mxu0 %v2669_v0  ;;  %2197 = vmatprep.subr.mxu1 %v2669_v0 }
  0xa9   : > { %2171 = vmatpush3.msra.mxu0 %v483_v46  ;;  %2198 = vmatpush3.msra.mxu1 %v2856_v6  ;;  %v1007_v6 = vld [vmem:[#allocation7 + $0x70] sm:$0xff]  ;;  %v3263_v46 = vsub.f32 %v1004_v24, %v3252_v30 }
  0xaa   : > { %2172 = vmatprep.subr.mxu0 %v2669_v0  ;;  %2199 = vmatprep.subr.mxu1 %v2669_v0  ;;  %v995_v24 = vld [vmem:[#allocation7 + $0x10] sm:$0xff] }
  0xab   : > { %2173 = vmatpush3.msra.mxu0 %v490_v53  ;;  %2200 = vmatpush3.msra.mxu1 %v2858_v10  ;;  %v3219_v10 = vsub.f32 %v1008_v4, %v3216_v5  ;;  %v1125_v53 = vsub.f32 %v3249_v29, %v1124_v43 }
  0xac   : > { %2174 = vmatprep.subr.mxu0 %v2669_v0  ;;  %2201 = vmatprep.subr.mxu1 %v2669_v0 }
  0xad   : > { %2175 = vmatpush3.msra.mxu0 %v497_v57  ;;  %2202 = vmatpush3.msra.mxu1 %v2860_v11  ;;  %v3221_v11 = vand.u32 4294901760, %v1007_v6  ;;  %v1103_v15 = vand.u32 4294901760, %v3219_v10  ;;  %v3272_v57 = vand.u32 4294901760, %v1002_v47 }
  0xae   : > { %2176 = vmatprep.subr.mxu0 %v2669_v0  ;;  %2203 = vmatprep.subr.mxu1 %v2669_v0 }
  0xaf   : > { %2177 = vmatpush3.msra.mxu0 %v504_v3  ;;  %2204 = vmatpush3.msra.mxu1 %v2862_v12  ;;  %v1006_v12 = vld [vmem:[#allocation7 + $0x68] sm:$0xff]  ;;  %v3227_v16 = vsub.f32 %v1007_v6, %v3221_v11  ;;  %v1104_v20 = vsub.f32 %v3219_v10, %v1103_v15  ;;  %v3280_v3 = vsub.f32 %v1002_v47, %v3272_v57  ;;  %v3636_v6 = vand.u32 4294901760, %v3330_v39 }
  0xb0   : > { %2178 = vmatprep.subr.mxu0 %v2669_v0  ;;  %2205 = vmatprep.subr.mxu1 %v2669_v0  ;;  %v994_v47 = vld [vmem:[#allocation7 + $0x8] sm:$0xff] }
  0xb1   : > { %2179 = vmatpush3.msra.mxu0 %v511_v19  ;;  %2206 = vmatpush3.msra.mxu1 %v2871_v17  ;;  %v3229_v17 = vand.u32 4294901760, %v1006_v12  ;;  %v1110_v21 = vand.u32 4294901760, %v3227_v16  ;;  %v1000_v19 = vld [vmem:[#allocation7 + $0x38] sm:$0xff]  ;;  %v1145_v31 = vand.u32 4294901760, %v3280_v3 }
  0xb2   : > { %2180 = vmatprep.subr.mxu0 %v2669_v0  ;;  %2207 = vmatprep.subr.mxu1 %v2669_v0 }
  0xb3   : > { %2181 = vmatpush3.msra.mxu0 %v518_v37  ;;  %2208 = vmatpush3.msra.mxu1 %v2887_v25  ;;  %v3238_v22 = vsub.f32 %v1006_v12, %v3229_v17  ;;  %v1105_v25 = vand.u32 4294901760, %v1104_v20  ;;  %v1111_v27 = vsub.f32 %v3227_v16, %v1110_v21  ;;  %v3297_v37 = vand.u32 4294901760, %v1000_v19 }
  0xb4   : > { %2182 = vmatprep.subr.mxu0 %v2669_v0  ;;  %2209 = vmatprep.subr.mxu1 %v2669_v0  ;;  %v1146_v49 = vsub.f32 %v3280_v3, %v1145_v31  ;;  %v3340_v12 = vsub.f32 %v997_v14, %v3332_v41 }
  0xb5   : > { %2183 = vmatpush3.msra.mxu0 %v525_v44  ;;  %2210 = vmatpush3.msra.mxu1 %v2891_v28  ;;  %v1117_v28 = vand.u32 4294901760, %v3238_v22  ;;  %v3307_v54 = vsub.f32 %v1000_v19, %v3297_v37  ;;  %v993_v19 = vld [vmem:[#allocation7] sm:$0xff] }
  0xb6   : > { %2184 = vmatprep.subr.mxu0 %v2669_v0  ;;  %2211 = vmatprep.subr.mxu1 %v2669_v0  ;;  %v1147_v60 = vand.u32 4294901760, %v1146_v49 }
  0xb7   : > { %2185 = vmatpush3.msra.mxu0 %v532_v52  ;;  %2212 = vmatpush3.msra.mxu1 %v2911_v35  ;;  %v1112_v35 = vand.u32 4294901760, %v1111_v27  ;;  %v1118_v40 = vsub.f32 %v3238_v22, %v1117_v28  ;;  %v1159_v2 = vand.u32 4294901760, %v3307_v54  ;;  %v3635_v27 = vand.u32 4294901760, %v3340_v12 }
  0xb8   : > { %2186 = vmatprep.subr.mxu0 %v2669_v0  ;;  %2213 = vmatprep.subr.mxu1 %v2669_v0 }
  0xb9   : > { %2187 = vmatpush3.msra.mxu0 %v539_v1  ;;  %2214 = vmatpush3.msra.mxu1 %v2926_v45  ;;  %v3259_v45 = vand.u32 4294901760, %v1003_v34  ;;  %v1160_v36 = vsub.f32 %v3307_v54, %v1159_v2 }
  0xba   : > { %2188 = vmatprep.subr.mxu0 %v2669_v0  ;;  %2215 = vmatprep.subr.mxu1 %v2669_v0 }
  0xbb   : > { %2189 = vmatpush3.msra.mxu0 %v546_v9  ;;  %2190 = vmatprep.mubr.msk.f32.mxu0 %vm2670_vm0, %v2669_v0  ;;  %v3270_v55 = vsub.f32 %v1003_v34, %v3259_v45  ;;  %v3322_v9 = vsub.f32 %v999_v42, %v3310_v56  ;;  %v1161_v4 = vand.u32 4294901760, %v1160_v36  ;;  %v3355_v34 = vsub.f32 %v996_v51, %v3342_v18 }
  0xbc   : > { %2216 = vmatpush3.msra.mxu1 %v2934_v48  ;;  %2191 = vmatmul.mubr.f32.vlgmr.msra.gmra.mxu0 %v2957_v62  ;;  %v1119_v48 = vand.u32 4294901760, %v1118_v40 }
  0xbd   : > { %2217 = vmatprep.subr.mxu1 %v2669_v0  ;;  %2225 = vmatprep.mubr.msk.f32.mxu1 %vm2670_vm0, %v2669_v0  ;;  %v3637_v50 = vand.u32 4294901760, %v3322_v9 }
  0xbe   : > { %2218 = vmatpush3.msra.mxu1 %v2952_v59  ;;  %2228 = vmatprep.subr.mxu0 %v2669_v0  ;;  %v1131_v59 = vand.u32 4294901760, %v3263_v46 }
  0xbf   : > { %2219 = vmatprep.subr.mxu1 %v2669_v0  ;;  %2260 = vmatprep.mubr.msk.f32.mxu0 %vm2670_vm0, %v2669_v0  ;;  %v1167_v20 = vsub.f32 %v3322_v9, %v3637_v50 }
  0xc0   : > { %2220 = vmatpush3.msra.mxu1 %v2961_v63  ;;  %2229 = vmatpush3.msra.mxu0 %v3216_v5  ;;  %v1138_v63 = vand.u32 4294901760, %v3270_v55 }
  0xc1   : > { %2221 = vmatprep.subr.mxu1 %v2669_v0  ;;  %2230 = vmatprep.subr.mxu0 %v2669_v0  ;;  %v1168_v40 = vand.u32 4294901760, %v1167_v20 }
  0xc2   : > { %2222 = vmatpush3.msra.mxu1 %v2976_v13  ;;  %2231 = vmatpush3.msra.mxu0 %v3221_v11  ;;  %v1132_v13 = vsub.f32 %v3263_v46, %v1131_v59  ;;  %v1139_v26 = vsub.f32 %v3270_v55, %v1138_v63 }
  0xc3   : > { %2223 = vmatprep.subr.mxu1 %v2669_v0  ;;  %2232 = vmatprep.subr.mxu0 %v2669_v0 }
  0xc4   : > { %2224 = vmatpush3.msra.mxu1 %v2988_v32  ;;  %2233 = vmatpush3.msra.mxu0 %v3229_v17  ;;  %v3295_v32 = vsub.f32 %v1001_v61, %v3282_v8  ;;  %v1133_v38 = vand.u32 4294901760, %v1132_v13  ;;  %v1140_v44 = vand.u32 4294901760, %v1139_v26  ;;  %v3634_v61 = vand.u32 4294901760, %v3355_v34 }
  0xc5   : > { %2226 = vmatmul.mubr.f32.vlgmr.msra.gmra.mxu1 %v2957_v62  ;;  %2263 = vmatprep.subr.mxu1 %v2669_v0  ;;  %v1126_v62 = vand.u32 4294901760, %v1125_v53  ;;  %v1181_v53 = vsub.f32 %v3340_v12, %v3635_v27  ;;  %v3370_v13 = vand.u32 4294901760, %v994_v47 }
  0xc6   : > { %2295 = vmatprep.mubr.msk.f32.mxu1 %vm2670_vm0, %v2669_v0  ;;  %2234 = vmatprep.subr.mxu0 %v2669_v0  ;;  %v1152_v52 = vand.u32 4294901760, %v3295_v32 }
  0xc7   : > { %2235 = vmatpush3.msra.mxu0 %v3240_v23  ;;  %2264 = vmatpush3.msra.mxu1 %v1105_v25  ;;  %v1174_v25 = vsub.f32 %v3330_v39, %v3636_v6  ;;  %v1182_v26 = vand.u32 4294901760, %v1181_v53  ;;  %v3382_v49 = vsub.f32 %v994_v47, %v3370_v13 }
  0xc8   : > { %2236 = vmatprep.subr.mxu0 %v2669_v0  ;;  %2265 = vmatprep.subr.mxu1 %v2669_v0  ;;  %v1153_v1 = vsub.f32 %v3295_v32, %v1152_v52 }
  0xc9   : > { %2237 = vmatpush3.msra.mxu0 %v3252_v30  ;;  %2266 = vmatpush3.msra.mxu1 %v1112_v35  ;;  %v3357_v35 = vand.u32 4294901760, %v995_v24  ;;  %v3632_v14 = vand.u32 4294901760, %v3382_v49 }
  0xca   : > { %2238 = vmatprep.subr.mxu0 %v2669_v0  ;;  %2267 = vmatprep.subr.mxu1 %v2669_v0  ;;  %v1154_v33 = vand.u32 4294901760, %v1153_v1 }
  0xcb   : > { %2239 = vmatpush3.msra.mxu0 %v3259_v45  ;;  %2268 = vmatpush3.msra.mxu1 %v1119_v48  ;;  %v1175_v48 = vand.u32 4294901760, %v1174_v25  ;;  %v1202_v51 = vsub.f32 %v3382_v49, %v3632_v14 }
  0xcc   : > { %2240 = vmatprep.subr.mxu0 %v2669_v0  ;;  %2269 = vmatprep.subr.mxu1 %v2669_v0 }
  0xcd   : > { %2241 = vmatpush3.msra.mxu0 %v3272_v57  ;;  %2270 = vmatpush3.msra.mxu1 %v1126_v62  ;;  %v3367_v62 = vsub.f32 %v995_v24, %v3357_v35  ;;  %v1203_v20 = vand.u32 4294901760, %v1202_v51 }
  0xce   : > { %2242 = vmatprep.subr.mxu0 %v2669_v0  ;;  %2271 = vmatprep.subr.mxu1 %v2669_v0 }
  0xcf   : > { %2243 = vmatpush3.msra.mxu0 %v3282_v8  ;;  %2272 = vmatpush3.msra.mxu1 %v1133_v38  ;;  %v1188_v38 = vsub.f32 %v3355_v34, %v3634_v61  ;;  %v3633_v42 = vand.u32 4294901760, %v3367_v62 }
  0xd0   : > { %2244 = vmatprep.subr.mxu0 %v2669_v0  ;;  %2273 = vmatprep.subr.mxu1 %v2669_v0 }
  0xd1   : > { %2245 = vmatpush3.msra.mxu0 %v3297_v37  ;;  %2274 = vmatpush3.msra.mxu1 %v1140_v44  ;;  %v3378_v44 = vand.u32 4294901760, %v993_v19  ;;  %v1189_v58 = vand.u32 4294901760, %v1188_v38 }
  0xd2   : > { %2246 = vmatprep.subr.mxu0 %v2669_v0  ;;  %2275 = vmatprep.subr.mxu1 %v2669_v0 }
  0xd3   : > { %2247 = vmatpush3.msra.mxu0 %v3310_v56  ;;  %2276 = vmatpush3.msra.mxu1 %v1147_v60  ;;  %v1195_v60 = vsub.f32 %v3367_v62, %v3633_v42  ;;  %v3390_v1 = vsub.f32 %v993_v19, %v3378_v44 }
  0xd4   : > { %2248 = vmatprep.subr.mxu0 %v2669_v0  ;;  %2277 = vmatprep.subr.mxu1 %v2669_v0 }
  0xd5   : > { %2249 = vmatpush3.msra.mxu0 %v3318_v7  ;;  %2278 = vmatpush3.msra.mxu1 %v1154_v33  ;;  %v1196_v33 = vand.u32 4294901760, %v1195_v60  ;;  %v3631_v36 = vand.u32 4294901760, %v3390_v1 }
  0xd6   : > { %2250 = vmatprep.subr.mxu0 %v2669_v0  ;;  %2279 = vmatprep.subr.mxu1 %v2669_v0 }
  0xd7   : > { %2251 = vmatpush3.msra.mxu0 %v3332_v41  ;;  %2280 = vmatpush3.msra.mxu1 %v1161_v4  ;;  %v1209_v4 = vsub.f32 %v3390_v1, %v3631_v36 }
  0xd8   : > { %2252 = vmatprep.subr.mxu0 %v2669_v0  ;;  %2281 = vmatprep.subr.mxu1 %v2669_v0 }
  0xd9   : > { %2253 = vmatpush3.msra.mxu0 %v3342_v18  ;;  %2282 = vmatpush3.msra.mxu1 %v1168_v40  ;;  %v1210_v24 = vand.u32 4294901760, %v1209_v4 }
  0xda   : > { %2254 = vmatprep.subr.mxu0 %v2669_v0  ;;  %2283 = vmatprep.subr.mxu1 %v2669_v0 }
  0xdb   : > { %2255 = vmatpush3.msra.mxu0 %v3357_v35  ;;  %2284 = vmatpush3.msra.mxu1 %v1175_v48 }
  0xdc   : > { %2256 = vmatprep.subr.mxu0 %v2669_v0  ;;  %2285 = vmatprep.subr.mxu1 %v2669_v0 }
  0xdd   : > { %2257 = vmatpush3.msra.mxu0 %v3370_v13  ;;  %2286 = vmatpush3.msra.mxu1 %v1182_v26 }
  0xde   : > { %2258 = vmatprep.subr.mxu0 %v2669_v0  ;;  %2287 = vmatprep.subr.mxu1 %v2669_v0 }
  0xdf   : > { %2259 = vmatpush3.msra.mxu0 %v3378_v44  ;;  %2288 = vmatpush3.msra.mxu1 %v1189_v58  ;;  %v1806_v58 = vld [vmem:[%s3621_s2] ss:$0 sm:$0xff] }
  0xe0   : > { %2298 = vmatprep.subr.mxu0 %v2669_v0  ;;  %2289 = vmatprep.subr.mxu1 %v2669_v0 }
  0xe1   : > { %2290 = vmatpush3.msra.mxu1 %v1196_v33 }
  0xe2   : > { %2291 = vmatprep.subr.mxu1 %v2669_v0 }
  0xe3   : > { %2292 = vmatpush3.msra.mxu1 %v1203_v20 }
  0xe4   : > { %2293 = vmatprep.subr.mxu1 %v2669_v0 }
  0xe5   : > { %2294 = vmatpush3.msra.mxu1 %v1210_v24 }
  0xe6   : > { %2333 = vmatprep.subr.mxu1 %v2669_v0 }
 0x13a   : > { %v434_v25 = vpop.f32.mrf.mxu0 }
 0x13b   : > { %v435_v60 = vadd.f32 %v1806_v58, %v434_v25 }
 0x13c   : > { %v2052_v40 = vpop.f32.mrf.mxu0 }
 0x141   : > { %v585_v47 = vpop.f32.mrf.mxu1 }
 0x142   : > { %v586_v51 = vadd.f32 %v585_v47, %v435_v60 }
 0x143   : > { %v2087_v48 = vpop.f32.mrf.mxu1 }
 0x15a   : > { %v689_v53 = vpop.f32.mrf.mxu0 }
 0x15b   : > { %v690_v20 = vadd.f32 %v689_v53, %v586_v51 }
 0x15c   : > { %v2122_v19 = vpop.f32.mrf.mxu0 }
 0x163   : > { %v778_v26 = vpop.f32.mrf.mxu1 }
 0x164   : > { %v779_v24 = vadd.f32 %v778_v26, %v690_v20 }
 0x165   : > { %v2157_v38 = vpop.f32.mrf.mxu1 }
 0x17c   : > { %v897_v33 = vpop.f32.mrf.mxu0 }
 0x17d   : > { %v898_v36 = vadd.f32 %v897_v33, %v779_v24 }
 0x17e   : > { %v2192_v4 = vpop.f32.mrf.mxu0 }
 0x185   : > { %v984_v14 = vpop.f32.mrf.mxu1 }
 0x186   : > { %v985_v42 = vadd.f32 %v984_v14, %v898_v36 }
 0x187   : > { %v2227_v40 = vpop.f32.mrf.mxu1 }
 0x188   : > { %v989_v61 = vmul.f32 0.70710677, %v985_v42  ;;  %v988_v19 = vmul.f32 0.5, %v985_v42 }
 0x18a   : > { %2509 = verf.f32 %v989_v61 }
 0x197   : > { %v2510_v48 = vpop.eup %2509 }
 0x198   : > { %v991_v27 = vadd.f32 1.0, %v2510_v48 }
 0x19a   : > { %v992_v38 = vmul.f32 %v991_v27, %v988_v19 }
 0x19c   : > { %v3411_v6 = vand.u32 4294901760, %v992_v38 }
 0x19e   : > { %v3414_v50 = vsub.f32 %v992_v38, %v3411_v6  ;;  %2296 = vmatmul.mubr.f32.vlgmr.msra.gmra.mxu1 %v3411_v6 }
 0x19f   : > { %2334 = vmatpush3.msra.mxu1 %v3216_v5  ;;  %2365 = vmatprep.mubr.msk.f32.mxu1 %vm2670_vm0, %v2669_v0 }
 0x1a0   : > { %2335 = vmatprep.subr.mxu1 %v2669_v0  ;;  %v1092_v61 = vand.u32 4294901760, %v3414_v50 }
 0x1a1   : > { %2336 = vmatpush3.msra.mxu1 %v3221_v11 }
 0x1a2   : > { %2337 = vmatprep.subr.mxu1 %v2669_v0  ;;  %v1093_v27 = vsub.f32 %v3414_v50, %v1092_v61 }
 0x1a3   : > { %2338 = vmatpush3.msra.mxu1 %v3229_v17 }
 0x1a4   : > { %2339 = vmatprep.subr.mxu1 %v2669_v0  ;;  %v1094_v42 = vand.u32 4294901760, %v1093_v27 }
 0x1a5   : > { %2340 = vmatpush3.msra.mxu1 %v3240_v23 }
 0x1a6   : > { %2341 = vmatprep.subr.mxu1 %v2669_v0  ;;  %2261 = vmatmul.mubr.f32.vlgmr.msra.gmra.mxu0 %v1094_v42 }
 0x1a7   : > { %2299 = vmatpush3.msra.mxu0 %v3219_v10  ;;  %2342 = vmatpush3.msra.mxu1 %v3252_v30  ;;  %v3654_v10 = vand.u32 4294901760, %v3330_v39 }
 0x1a8   : > { %2300 = vmatprep.subr.mxu0 %v2669_v0  ;;  %2343 = vmatprep.subr.mxu1 %v2669_v0 }
 0x1a9   : > { %2301 = vmatpush3.msra.mxu0 %v3227_v16  ;;  %2344 = vmatpush3.msra.mxu1 %v3259_v45  ;;  %v3657_v16 = vand.u32 4294901760, %v3367_v62 }
 0x1aa   : > { %2302 = vmatprep.subr.mxu0 %v2669_v0  ;;  %2345 = vmatprep.subr.mxu1 %v2669_v0 }
 0x1ab   : > { %2303 = vmatpush3.msra.mxu0 %v3238_v22  ;;  %2346 = vmatpush3.msra.mxu1 %v3272_v57 }
 0x1ac   : > { %2304 = vmatprep.subr.mxu0 %v2669_v0  ;;  %2347 = vmatprep.subr.mxu1 %v2669_v0 }
 0x1ad   : > { %2305 = vmatpush3.msra.mxu0 %v3249_v29  ;;  %2348 = vmatpush3.msra.mxu1 %v3282_v8 }
 0x1ae   : > { %2306 = vmatprep.subr.mxu0 %v2669_v0  ;;  %2349 = vmatprep.subr.mxu1 %v2669_v0 }
 0x1af   : > { %2307 = vmatpush3.msra.mxu0 %v3263_v46  ;;  %2350 = vmatpush3.msra.mxu1 %v3297_v37 }
 0x1b0   : > { %2308 = vmatprep.subr.mxu0 %v2669_v0  ;;  %2351 = vmatprep.subr.mxu1 %v2669_v0 }
 0x1b1   : > { %2309 = vmatpush3.msra.mxu0 %v3270_v55  ;;  %2352 = vmatpush3.msra.mxu1 %v3310_v56 }
 0x1b2   : > { %2310 = vmatprep.subr.mxu0 %v2669_v0  ;;  %2353 = vmatprep.subr.mxu1 %v2669_v0 }
 0x1b3   : > { %2311 = vmatpush3.msra.mxu0 %v3280_v3  ;;  %2354 = vmatpush3.msra.mxu1 %v3318_v7 }
 0x1b4   : > { %2312 = vmatprep.subr.mxu0 %v2669_v0  ;;  %2355 = vmatprep.subr.mxu1 %v2669_v0 }
 0x1b5   : > { %2313 = vmatpush3.msra.mxu0 %v3295_v32  ;;  %2356 = vmatpush3.msra.mxu1 %v3332_v41 }
 0x1b6   : > { %2314 = vmatprep.subr.mxu0 %v2669_v0  ;;  %2357 = vmatprep.subr.mxu1 %v2669_v0 }
 0x1b7   : > { %2315 = vmatpush3.msra.mxu0 %v3307_v54  ;;  %2358 = vmatpush3.msra.mxu1 %v3342_v18 }
 0x1b8   : > { %2316 = vmatprep.subr.mxu0 %v2669_v0  ;;  %2359 = vmatprep.subr.mxu1 %v2669_v0 }
 0x1b9   : > { %2317 = vmatpush3.msra.mxu0 %v3322_v9  ;;  %2360 = vmatpush3.msra.mxu1 %v3357_v35 }
 0x1ba   : > { %2318 = vmatprep.subr.mxu0 %v2669_v0  ;;  %2361 = vmatprep.subr.mxu1 %v2669_v0 }
 0x1bb   : > { %2319 = vmatpush3.msra.mxu0 %v3330_v39  ;;  %2362 = vmatpush3.msra.mxu1 %v3370_v13 }
 0x1bc   : > { %2320 = vmatprep.subr.mxu0 %v2669_v0  ;;  %2363 = vmatprep.subr.mxu1 %v2669_v0 }
 0x1bd   : > { %2321 = vmatpush3.msra.mxu0 %v3340_v12  ;;  %2364 = vmatpush3.msra.mxu1 %v3378_v44 }
 0x1be   : > { %2322 = vmatprep.subr.mxu0 %v2669_v0  ;;  %2366 = vmatmul.mubr.f32.vlgmr.msra.gmra.mxu1 %v1092_v61 }
 0x1bf   : > { %2403 = vmatprep.subr.mxu1 %v2669_v0  ;;  %2323 = vmatpush3.msra.mxu0 %v3355_v34 }
 0x1c0   : > { %2404 = vmatpush3.msra.mxu1 %v3216_v5  ;;  %2324 = vmatprep.subr.mxu0 %v2669_v0  ;;  %v3653_v5 = vand.u32 4294901760, %v3322_v9 }
 0x1c1   : > { %2405 = vmatprep.subr.mxu1 %v2669_v0  ;;  %2325 = vmatpush3.msra.mxu0 %v3367_v62  ;;  %v1808_v62 = vld [vmem:[%s3624_s5] ss:$0 sm:$0xff] }
 0x1c2   : > { %2406 = vmatpush3.msra.mxu1 %v3221_v11  ;;  %2326 = vmatprep.subr.mxu0 %v2669_v0  ;;  %v3655_v11 = vand.u32 4294901760, %v3340_v12 }
 0x1c3   : > { %2407 = vmatprep.subr.mxu1 %v2669_v0  ;;  %2327 = vmatpush3.msra.mxu0 %v3382_v49 }
 0x1c4   : > { %2408 = vmatpush3.msra.mxu1 %v3229_v17  ;;  %2328 = vmatprep.subr.mxu0 %v2669_v0  ;;  %v3658_v17 = vand.u32 4294901760, %v3382_v49 }
 0x1c5   : > { %2409 = vmatprep.subr.mxu1 %v2669_v0  ;;  %2329 = vmatpush3.msra.mxu0 %v3390_v1 }
 0x1c6   : > { %2330 = vmatprep.mubr.msk.f32.mxu0 %vm2670_vm0, %v2669_v0  ;;  %2410 = vmatpush3.msra.mxu1 %v3240_v23 }
 0x1c7   : > { %2331 = vmatmul.mubr.f32.vlgmr.msra.gmra.mxu0 %v3414_v50  ;;  %2368 = vmatprep.subr.mxu0 %v2669_v0 }
 0x1c8   : > { %2411 = vmatprep.subr.mxu1 %v2669_v0  ;;  %2369 = vmatpush3.msra.mxu0 %v1103_v15  ;;  %v3656_v15 = vand.u32 4294901760, %v3355_v34 }
 0x1c9   : > { %2412 = vmatpush3.msra.mxu1 %v3252_v30  ;;  %2370 = vmatprep.subr.mxu0 %v2669_v0 }
 0x1ca   : > { %2413 = vmatprep.subr.mxu1 %v2669_v0  ;;  %2371 = vmatpush3.msra.mxu0 %v1110_v21  ;;  %v3659_v21 = vand.u32 4294901760, %v3390_v1 }
 0x1cb   : > { %2414 = vmatpush3.msra.mxu1 %v3259_v45  ;;  %2372 = vmatprep.subr.mxu0 %v2669_v0 }
 0x1cc   : > { %2415 = vmatprep.subr.mxu1 %v2669_v0  ;;  %2373 = vmatpush3.msra.mxu0 %v1117_v28 }
 0x1cd   : > { %2416 = vmatpush3.msra.mxu1 %v3272_v57  ;;  %2374 = vmatprep.subr.mxu0 %v2669_v0 }
 0x1ce   : > { %2417 = vmatprep.subr.mxu1 %v2669_v0  ;;  %2375 = vmatpush3.msra.mxu0 %v1124_v43 }
 0x1cf   : > { %2418 = vmatpush3.msra.mxu1 %v3282_v8  ;;  %2376 = vmatprep.subr.mxu0 %v2669_v0 }
 0x1d0   : > { %2419 = vmatprep.subr.mxu1 %v2669_v0  ;;  %2377 = vmatpush3.msra.mxu0 %v1131_v59 }
 0x1d1   : > { %2420 = vmatpush3.msra.mxu1 %v3297_v37  ;;  %2378 = vmatprep.subr.mxu0 %v2669_v0  ;;  %v1807_v37 = vld [vmem:[%s3623_s4] ss:$0 sm:$0xff] }
 0x1d2   : > { %2421 = vmatprep.subr.mxu1 %v2669_v0  ;;  %2379 = vmatpush3.msra.mxu0 %v1138_v63 }
 0x1d3   : > { %2422 = vmatpush3.msra.mxu1 %v3310_v56  ;;  %2380 = vmatprep.subr.mxu0 %v2669_v0 }
 0x1d4   : > { %2423 = vmatprep.subr.mxu1 %v2669_v0  ;;  %2381 = vmatpush3.msra.mxu0 %v1145_v31 }
 0x1d5   : > { %2424 = vmatpush3.msra.mxu1 %v3318_v7  ;;  %2382 = vmatprep.subr.mxu0 %v2669_v0 }
 0x1d6   : > { %2425 = vmatprep.subr.mxu1 %v2669_v0  ;;  %2383 = vmatpush3.msra.mxu0 %v1152_v52  ;;  %v2513_v52 = vld [vmem:[%s2836_s3] sm:$0xff]  ;;  %s1703_s3 = scalar_lea.hbm %s3626_s7, %s1811_s17 }
 0x1d7   : > { %2426 = vmatpush3.msra.mxu1 %v3332_v41  ;;  %2384 = vmatprep.subr.mxu0 %v2669_v0 }
 0x1d8   : > { %2427 = vmatprep.subr.mxu1 %v2669_v0  ;;  %2385 = vmatpush3.msra.mxu0 %v1159_v2  ;;  %v1665_v2 = vlaneseq }
 0x1d9   : > { %2428 = vmatpush3.msra.mxu1 %v3342_v18  ;;  %2386 = vmatprep.subr.mxu0 %v2669_v0 }
 0x1da   : > { %2429 = vmatprep.subr.mxu1 %v2669_v0  ;;  %2387 = vmatpush3.msra.mxu0 %v3653_v5  ;;  %v1666_v7 = vand.u32 127, %v1665_v2 }
 0x1db   : > { %2430 = vmatpush3.msra.mxu1 %v3357_v35  ;;  %2388 = vmatprep.subr.mxu0 %v2669_v0 }
 0x1dc   : > { %2431 = vmatprep.subr.mxu1 %v2669_v0  ;;  %2389 = vmatpush3.msra.mxu0 %v3654_v10  ;;  %vm1667_vm1 = vcmp.lt.s32.totalorder %v1666_v7, 32 }
 0x1dd   : > { %2432 = vmatpush3.msra.mxu1 %v3370_v13  ;;  %2390 = vmatprep.subr.mxu0 %v2669_v0 }
 0x1de   : > { %2433 = vmatprep.subr.mxu1 %v2669_v0  ;;  %2391 = vmatpush3.msra.mxu0 %v3655_v11 }
 0x1df   : > { %2434 = vmatpush3.msra.mxu1 %v3378_v44  ;;  %2435 = vmatprep.mubr.msk.f32.mxu1 %vm2670_vm0, %v2669_v0  ;;  %v1809_v44 = vld [vmem:[%s3625_s6] ss:$0 sm:$0xff] }
 0x1e0   : > { %2392 = vmatprep.subr.mxu0 %v2669_v0  ;;  %2436 = vmatmul.mubr.f32.vlgmr.msra.gmra.mxu1 %v3411_v6 }
 0x1e1   : > { %2393 = vmatpush3.msra.mxu0 %v3656_v15  ;;  %2400 = vmatprep.mubr.msk.f32.mxu0 %vm2670_vm0, %v2669_v0 }
 0x1e2   : > { %2394 = vmatprep.subr.mxu0 %v2669_v0 }
 0x1e3   : > { %2395 = vmatpush3.msra.mxu0 %v3657_v16 }
 0x1e4   : > { %2396 = vmatprep.subr.mxu0 %v2669_v0 }
 0x1e5   : > { %2397 = vmatpush3.msra.mxu0 %v3658_v17 }
 0x1e6   : > { %2398 = vmatprep.subr.mxu0 %v2669_v0 }
 0x1e7   : > { %2399 = vmatpush3.msra.mxu0 %v3659_v21 }
 0x1e8   : > { %2401 = vmatmul.mubr.f32.vlgmr.msra.gmra.mxu0 %v3411_v6 }
 0x25e   : > { %v1247_v22 = vpop.f32.mrf.mxu1 }
 0x260   : > { %v2297_v23 = vpop.f32.mrf.mxu1 }
 0x266   : > { %v1096_v28 = vpop.f32.mrf.mxu0 }
 0x267   : > { %v1248_v57 = vadd.f32 %v1247_v22, %v1096_v28 }
 0x268   : > { %v2262_v29 = vpop.f32.mrf.mxu0 }
 0x27e   : > { %v1440_v30 = vpop.f32.mrf.mxu1 }
 0x280   : > { %v2367_v43 = vpop.f32.mrf.mxu1 }
 0x287   : > { %v1351_v45 = vpop.f32.mrf.mxu0 }
 0x288   : > { %v1352_v63 = vadd.f32 %v1351_v45, %v1248_v57 }
 0x289   : > { %v2332_v46 = vpop.f32.mrf.mxu0 }
 0x28a   : > { %v1441_v3 = vadd.f32 %v1440_v30, %v1352_v63 }
 0x2a0   : > { %v1646_v55 = vpop.f32.mrf.mxu1 }
 0x2a2   : > { %v2437_v59 = vpop.f32.mrf.mxu1 }
 0x2a8   : > { %v1559_v0 = vpop.f32.mrf.mxu0 }
 0x2a9   : > { %v1560_v8 = vadd.f32 %v1559_v0, %v1441_v3 }
 0x2aa   : > { %v2402_v31 = vpop.f32.mrf.mxu0 }
 0x2ab   : > { %v1647_v32 = vadd.f32 %v1646_v55, %v1560_v8 }
 0x2ad   : > { %v1653_v54 = vadd.f32 %v2513_v52, %v1647_v32 }
 0x2af   : > { %v1660_v56 = vadd.f32 %v1807_v37, %v1653_v54 }
 0x2b1   : > { %1661 = vadd.xlane.f32.xlu0 %v1660_v56 }
 0x33a   : > { %v1662_v9 = vpop.xlane.xlu0 %1661 }
 0x33b   : > { %v1663_v39 = vmul.f32 0.03125, %v1662_v9 }
 0x33d   : > { %v1664_v41 = vsub.f32 %v1660_v56, %v1663_v39 }
 0x33f   : > { %v1668_v50 = vsel %vm1667_vm1, %v1664_v41, 0.0 }
 0x340   : > { %v1669_v6 = vmul.f32 %v1668_v50, %v1668_v50 }
 0x342   : > { %1670 = vadd.xlane.f32.xlu0 %v1669_v6 }
 0x3cb   : > { %v1671_v12 = vpop.xlane.xlu0 %1670 }
 0x3cc   : > { %v1672_v18 = vmul.f32 0.03125, %v1671_v12 }
 0x3ce   : > { %v1673_v34 = vadd.f32 1e-06, %v1672_v18 }
 0x3d0   : > { %2511 = vrsqrt.f32 %v1673_v34 }
 0x3dd   : > { %v2512_v35 = vpop.eup %2511 }
 0x3de   : > { %v1675_v13 = vmul.f32 %v2512_v35, %v1668_v50 }
 0x3e0   : > { %v1682_v49 = vmul.f32 %v1808_v62, %v1675_v13 }
 0x3e2   : > { %v1689_v1 = vadd.f32 %v1809_v44, %v1682_v49 }
 0x3e4   : > { %1690 = vst [vmem:[%s322_s15] sm:$0xff] %v1689_v1 }
 0x3e5   : > { %2607 = shalt.err (!%p2604_p9)
}
 0x3e6   : > { %s2608_s10 = scalar_lea.hbm %s1703_s3, 128  ;;  %s2612_s22 = scalar_lea.hbm %s3626_s7, 256 }
 0x3e7   : > { %p2609_p13 = scmp.ne.s32.totalorder %s1703_s3, %s2608_s10  ;;  %p2613_p4 = scmp.lt.s32.totalorder %s1703_s3, %s3626_s7 }
 0x3e8   : > { %p2614_p8 = scmp.lt.s32.totalorder %s2612_s22, %s2608_s10 }
 0x3e9   : > { %p2610_p5 = pnand %p2609_p13, %p3660_p0 }
 0x3ea   : > { %p2615_p3 = por %p2614_p8, %p2613_p4 }
 0x3eb   : > { %p2611_p10 = pneg %p2610_p5 }
 0x3ed   : > { %p2616_p11 = pnand %p2615_p3, %p2611_p10 }
 0x3ef   : > { %2619 = shalt.err (!%p2616_p11)
}
 0x3f0   : > { %2448 = dma.vmem_to_hbm [thread:$0]  (%p3660_p0), %s1706_s19, 128, %s1703_s3, %s1692_s30  }
 0x3f1 PF: > { %s1717_s17 = sand.u32 1, %s2650_s24   ;;  %p3661_p1 = scmp.ne.s32.totalorder %s3641_s8, 0 }
 0x3f2   : > { %p3662_p2 = scmp.ge.s32.totalorder %s2662_s27, 2  ;;  %s1718_s15 = scalar_lea.sflag [#allocation4], %s1717_s17 }
 0x3f4   : > { %p2462_p6 = pnand %p3662_p2, %p3661_p1 }
 0x3f6   : > { %p2463_p12 = pneg %p2462_p6 }
 0x3f8   : > { %2645 = dma.done.wait (%p2463_p12), %s1718_s15, 128  }
 0x3f9   : > { %2647 = vsyncadd (%p2463_p12), %s1718_s15, 4294967168  ;;  %p21_p7 = scmp.ge.s32.totalorder %s2784_s23, 4   ;;  %s3663_s24 = smov %s2654_s25 }
 0x3fa   : > { %s3664_s25 = smov %s2658_s26  ;;  %s3665_s26 = smov %s2800_s12 }
 0x3fb   : > { %s3666_s27 = smov %s2784_s23  ;;  %23 = sbr.rel (!%p21_p7) target bundleno = 9 (0x9), region = 101 }
 0x400   :  { %1723 = vsyncpa [#allocation3], 1 }
 0x401   :  { %1725 = vsyncpa [#allocation3 + $0x1], 1 }
 0x402   :  { %1726 = vsyncpa [#allocation6], 1 }
 0x403   :  { %1727 = vsyncpa [#allocation4], 1 }
 0x404   :  { %1729 = vsyncpa [#allocation4 + $0x1], 1 }

</bundles_post_ra>
